<compile_context>
chip_gen: v6e
topology: v6e:2x2x1
jax: 0.10.0
libtpu: 0.0.40
codegen_flags: <defaults>
</compile_context>

<pallas_src>
import functools

import jax
import jax.numpy as jnp
from jax import lax
from jax.experimental import pallas as pl
from jax.experimental.pallas import tpu as pltpu

EPS = 1e-5


# -----------------------------------------------------------------------------
# Fused kernel (one grid step = one (batch, H-tile) output block)
# -----------------------------------------------------------------------------
def _bottleneck_kernel(*refs, n_tiles):
    if n_tiles > 1:
        (x_ref, x_hbm, w1_ref, b1_ref, w2_ref, b2_ref, w3_ref, b3_ref,
         o_ref, xh_ref, dma_sem) = refs
    else:
        (x_ref, w1_ref, b1_ref, w2_ref, b2_ref, w3_ref, b3_ref, o_ref) = refs

    _, TH, W, C1 = x_ref.shape          # x_ref: (1, TH, W, C1) f32, also residual
    C2 = w1_ref.shape[1]                # w1: (C1, C2) bf16, bn1 scale folded in
    C3 = w3_ref.shape[1]                # w3: (C2, C3) bf16, bn3 scale folded in
    M = TH * W                          # matmul M dim
    ME = (TH + 2) * W                   # row-extended (halo) flat length

    # ---- (multi-tile only) kick off halo-row DMAs; they overlap the interior
    #      conv1 matmul below.  Rows are clamped at the border; clamped fetches
    #      are zeroed out later so the wasted data never matters.
    if n_tiles > 1:
        n = pl.program_id(0)
        t = pl.program_id(1)
        H = n_tiles * TH
        top_row = jnp.maximum(t * TH - 1, 0)
        bot_row = jnp.minimum(t * TH + TH, H - 1)
        cp_top = pltpu.make_async_copy(x_hbm.at[n, top_row], xh_ref.at[0],
                                       dma_sem.at[0])
        cp_bot = pltpu.make_async_copy(x_hbm.at[n, bot_row], xh_ref.at[1],
                                       dma_sem.at[1])
        cp_top.start()
        cp_bot.start()

    # ---- conv1 + bn1 + relu (bf16 MXU operands, f32 accumulate / epilogue) ---
    x_f32 = x_ref[...].reshape(M, C1)
    h1 = jnp.dot(x_f32.astype(jnp.bfloat16), w1_ref[...],
                 preferred_element_type=jnp.float32)
    h1 = jnp.maximum(h1 + b1_ref[...], 0.0)                    # (M, C2) f32

    # ---- conv1 output on the halo rows (zeros outside the image: conv2's SAME
    #      padding zero-pads conv1's *output*, not conv1(0)).
    if n_tiles > 1:
        cp_top.wait()
        cp_bot.wait()
        xh = xh_ref[...].reshape(2 * W, C1)
        hh = jnp.dot(xh.astype(jnp.bfloat16), w1_ref[...],
                     preferred_element_type=jnp.float32)
        hh = jnp.maximum(hh + b1_ref[...], 0.0)                # (2W, C2) f32
        top = hh[:W] * (t > 0).astype(jnp.float32)
        bot = hh[W:] * (t < n_tiles - 1).astype(jnp.float32)
    else:
        top = jnp.zeros((W, C2), jnp.float32)
        bot = jnp.zeros((W, C2), jnp.float32)

    h1_ext = jnp.concatenate([top, h1, bot], axis=0)           # (ME, C2) f32

    # ---- conv2 (3x3, stride 1, pad 1) + bn2 + relu ---------------------------
    # Column shifts via sublane rolls (XLU) + iota masks on the *input*; the
    # wrap positions coincide exactly with the zero-padded border columns, so
    # one mask per shifted copy is enough.  ky is a static, aligned row slice
    # of the extended buffer.  Accumulate into a traced value (no scratch RMW).
    col = lax.broadcasted_iota(jnp.int32, (ME, 1), 0) % W
    left = jnp.where(col >= 1, pltpu.roll(h1_ext, shift=1, axis=0), 0.0)
    right = jnp.where(col < W - 1, pltpu.roll(h1_ext, shift=ME - 1, axis=0), 0.0)
    taps = (left.astype(jnp.bfloat16),      # kx = 0  (input col c-1 -> out col c)
            h1_ext.astype(jnp.bfloat16),    # kx = 1
            right.astype(jnp.bfloat16))     # kx = 2  (input col c+1 -> out col c)

    acc = None
    for ky in range(3):
        for kx in range(3):
            slab = taps[kx][ky * W:ky * W + M]                 # (M, C2) bf16
            p = jnp.dot(slab, w2_ref[3 * ky + kx],
                        preferred_element_type=jnp.float32)
            acc = p if acc is None else acc + p
    h2 = jnp.maximum(acc + b2_ref[...], 0.0)                   # (M, C2) f32

    # ---- conv3 + bn3 + residual add + relu -----------------------------------
    y = jnp.dot(h2.astype(jnp.bfloat16), w3_ref[...],
                preferred_element_type=jnp.float32)
    y = jnp.maximum(y + b3_ref[...] + x_f32, 0.0)              # residual (C3==C1)
    o_ref[...] = y.reshape(1, TH, W, C3).astype(o_ref.dtype)


# -----------------------------------------------------------------------------
# Wrapper
# -----------------------------------------------------------------------------
def _fold_bn(bn):
    gamma, beta, mean, var = bn
    scale = gamma / jnp.sqrt(var + EPS)
    bias = beta - mean * scale
    return scale.astype(jnp.float32), bias.astype(jnp.float32)


def _pick_tile_h(H, W, C1, C2, C3, budget_bytes):
    """Largest H-tile whose estimated per-step VMEM footprint fits the budget
    (budget sized for v7x's 64 MiB physical VMEM; v5e/v6e have headroom)."""
    def est(th):
        m, me = th * W, (th + 2) * W
        act = (2 * m * C1 * 4 + 2 * m * C3 * 4          # x / out blocks (double-buffered)
               + 3 * me * C2 * 6                        # h1_ext / left / right (f32 + bf16)
               + 3 * m * C2 * 4 + m * C2 * 2            # h1 / acc / h2 (+ bf16 copy)
               + m * C3 * 4 + m * C1 * 4)               # y, x_f32
        wts = 4 * (C1 * C2 + 9 * C2 * C2 + C2 * C3)     # bf16 weights, double-buffered
        return int(1.3 * (act + wts))

    if est(H) <= budget_bytes:
        return H, 1                                     # whole image: no halo path
    fits = [d for d in range(8, H, 8) if H % d == 0 and est(d) <= budget_bytes]
    if fits:
        th = max(fits)
        return th, H // th
    # TODO(synk): awkward H with no fitting multiple-of-8 divisor; fall back to
    # whole-image tiles (may exceed the VMEM budget on very large inputs).
    return H, 1


def bottleneck_forward(x_nchw, params, *, vmem_budget_bytes=36 * 1024 * 1024):
    """Fused Bottleneck forward (stride=1, downsample=None). NCHW in/out."""
    N, C1, H, W = x_nchw.shape
    w1 = params["conv1_w"]            # (C2, C1, 1, 1)  OIHW
    w2 = params["conv2_w"]            # (C2, C2, 3, 3)
    w3 = params["conv3_w"]            # (C3, C2, 1, 1)
    C2 = w1.shape[0]
    C3 = w3.shape[0]
    assert C3 == C1, "identity residual requires inplanes == planes * expansion"
    assert W % 8 == 0, "W must be a multiple of 8 (sublane tiling)"

    # Fold eval-mode BN scale into the conv weights (bf16 for the MXU);
    # biases stay f32 for the epilogues.
    s1, b1 = _fold_bn(params["bn1"])
    s2, b2 = _fold_bn(params["bn2"])
    s3, b3 = _fold_bn(params["bn3"])
    w1_mat = (w1.reshape(C2, C1).T * s1[None, :]).astype(jnp.bfloat16)   # (C1, C2)
    w2_taps = ((jnp.transpose(w2, (2, 3, 1, 0))                          # (ky,kx,ci,co)
                * s2[None, None, None, :])
               .reshape(9, C2, C2).astype(jnp.bfloat16))
    w3_mat = (w3.reshape(C3, C2).T * s3[None, :]).astype(jnp.bfloat16)   # (C2, C3)
    b1 = b1[None, :]
    b2 = b2[None, :]
    b3 = b3[None, :]

    x = jnp.transpose(x_nchw, (0, 2, 3, 1)).astype(jnp.float32)          # NHWC

    TH, T = _pick_tile_h(H, W, C1, C2, C3, vmem_budget_bytes)
    kernel = functools.partial(_bottleneck_kernel, n_tiles=T)

    flops = 2 * N * H * W * (C1 * C2 + 9 * C2 * C2 + C2 * C3)
    bytes_accessed = (4 * (x.size + N * H * W * C3)
                      + 2 * (w1_mat.size + w2_taps.size + w3_mat.size))

    if T == 1:
        # Whole-image tiles: no halo DMA / halo conv / boundary fix-ups.
        # Grid (N,) is "parallel": N>=2 keeps both v7x TensorCores busy.
        grid = (N,)
        in_specs = [
            pl.BlockSpec((1, H, W, C1), lambda n: (n, 0, 0, 0)),   # x tile (residual)
            pl.BlockSpec((C1, C2), lambda n: (0, 0)),              # w1
            pl.BlockSpec((1, C2), lambda n: (0, 0)),               # b1
            pl.BlockSpec((9, C2, C2), lambda n: (0, 0, 0)),        # w2 taps
            pl.BlockSpec((1, C2), lambda n: (0, 0)),               # b2
            pl.BlockSpec((C2, C3), lambda n: (0, 0)),              # w3
            pl.BlockSpec((1, C3), lambda n: (0, 0)),               # b3
        ]
        out_specs = pl.BlockSpec((1, H, W, C3), lambda n: (n, 0, 0, 0))
        scratch_shapes = []
        dims = ("parallel",)
        args = (x, w1_mat, b1, w2_taps, b2, w3_mat, b3)
    else:
        # Fallback: split H; the 1-row halo is fetched with small manual DMAs
        # overlapped with the (large, budget-sized) interior conv1 matmul.
        grid = (N, T)
        in_specs = [
            pl.BlockSpec((1, TH, W, C1), lambda n, t: (n, t, 0, 0)),  # x tile
            pl.BlockSpec(memory_space=pl.ANY),                        # x (halo src)
            pl.BlockSpec((C1, C2), lambda n, t: (0, 0)),              # w1
            pl.BlockSpec((1, C2), lambda n, t: (0, 0)),               # b1
            pl.BlockSpec((9, C2, C2), lambda n, t: (0, 0, 0)),        # w2 taps
            pl.BlockSpec((1, C2), lambda n, t: (0, 0)),               # b2
            pl.BlockSpec((C2, C3), lambda n, t: (0, 0)),              # w3
            pl.BlockSpec((1, C3), lambda n, t: (0, 0)),               # b3
        ]
        out_specs = pl.BlockSpec((1, TH, W, C3), lambda n, t: (n, t, 0, 0))
        scratch_shapes = [
            pltpu.VMEM((2, W, C1), jnp.float32),      # halo input rows
            pltpu.SemaphoreType.DMA((2,)),
        ]
        dims = ("parallel", "parallel")
        args = (x, x, w1_mat, b1, w2_taps, b2, w3_mat, b3)

    out_nhwc = pl.pallas_call(
        kernel,
        out_shape=jax.ShapeDtypeStruct((N, H, W, C3), jnp.float32),
        grid=grid,
        in_specs=in_specs,
        out_specs=out_specs,
        scratch_shapes=scratch_shapes,
        compiler_params=pltpu.CompilerParams(
            dimension_semantics=dims,
            vmem_limit_bytes=48 * 1024 * 1024),
        cost_estimate=pl.CostEstimate(flops=flops, transcendentals=0,
                                      bytes_accessed=bytes_accessed),
    )(*args)

    return jnp.transpose(out_nhwc, (0, 3, 1, 2))       # back to NCHW


# -----------------------------------------------------------------------------
# Pure-JAX reference (NCHW, PyTorch eval-mode semantics, full f32)
# -----------------------------------------------------------------------------
def bottleneck_reference(x, params):
    dn = ("NCHW", "OIHW", "NCHW")

    def bn(y, p):
        g, b, m, v = p
        inv = g / jnp.sqrt(v + EPS)
        return y * inv[None, :, None, None] + (b - m * inv)[None, :, None, None]

    out = lax.conv_general_dilated(x, params["conv1_w"], (1, 1), "VALID",
                                   dimension_numbers=dn)
    out = jax.nn.relu(bn(out, params["bn1"]))
    out = lax.conv_general_dilated(out, params["conv2_w"], (1, 1),
                                   [(1, 1), (1, 1)], dimension_numbers=dn)
    out = jax.nn.relu(bn(out, params["bn2"]))
    out = lax.conv_general_dilated(out, params["conv3_w"], (1, 1), "VALID",
                                   dimension_numbers=dn)
    out = bn(out, params["bn3"])
    return jax.nn.relu(out + x)


# -----------------------------------------------------------------------------
# Main
# -----------------------------------------------------------------------------
def make_params(key, inplanes, planes):
    expansion = 4
    ks = jax.random.split(key, 16)

    def bn_params(k, c):
        k1, k2, k3, k4 = jax.random.split(k, 4)
        gamma = 0.5 + jax.random.uniform(k1, (c,), jnp.float32)
        beta = 0.1 * jax.random.normal(k2, (c,), jnp.float32)
        mean = 0.1 * jax.random.normal(k3, (c,), jnp.float32)
        var = 0.5 + jax.random.uniform(k4, (c,), jnp.float32)
        return (gamma, beta, mean, var)

    return {
        "conv1_w": 0.1 * jax.random.normal(ks[0], (planes, inplanes, 1, 1), jnp.float32),
        "bn1": bn_params(ks[1], planes),
        "conv2_w": 0.1 * jax.random.normal(ks[2], (planes, planes, 3, 3), jnp.float32),
        "bn2": bn_params(ks[3], planes),
        "conv3_w": 0.1 * jax.random.normal(ks[4], (planes * expansion, planes, 1, 1), jnp.float32),
        "bn3": bn_params(ks[5], planes * expansion),
    }


if __name__ == "__main__":
    key = jax.random.PRNGKey(0)
    k_x, k_p = jax.random.split(key)

    # N=2, inplanes=16, planes=4 (expansion 4 -> 16 out channels), 16x16,
    # stride=1, downsample=None.  Whole-image tiles -> grid (2,), both TCs busy.
    N, inplanes, planes, H, W = 2, 16, 4, 16, 16
    x = jax.random.normal(k_x, (N, inplanes, H, W), jnp.float32)  # NCHW
    params = make_params(k_p, inplanes, planes)

    fwd = jax.jit(functools.partial(bottleneck_forward, params=params))
    out = jax.block_until_ready(fwd(x))

    ref = jax.block_until_ready(bottleneck_reference(x, params))
    assert out.shape == (N, planes * 4, H, W)
    # bf16 MXU operands vs. a full-f32 reference -> looser tolerance than the
    # old all-f32 kernel (still far below any structural-bug error level).
    err = float(jnp.max(jnp.abs(out - ref)))
    assert err < 1e-1, f"mismatch vs reference: {err}"

    print("KERNEL_OK")
</pallas_src>

<mosaic_0001>
module attributes {stable_mosaic.version = 11 : i64} {
  func.func @_bottleneck_kernel(%arg0: i32, %arg1: memref<1x16x16x16xf32, #tpu.memory_space<vmem>>, %arg2: memref<16x4xbf16, #tpu.memory_space<vmem>>, %arg3: memref<1x4xf32, #tpu.memory_space<vmem>>, %arg4: memref<9x4x4xbf16, #tpu.memory_space<vmem>>, %arg5: memref<1x4xf32, #tpu.memory_space<vmem>>, %arg6: memref<4x16xbf16, #tpu.memory_space<vmem>>, %arg7: memref<1x16xf32, #tpu.memory_space<vmem>>, %arg8: memref<1x16x16x16xf32, #tpu.memory_space<vmem>>) attributes {dimension_semantics = [#tpu.dimension_semantics<parallel>], iteration_bounds = array<i64: 2>, scalar_prefetch = 0 : i64, scratch_operands = 0 : i64, tpu.core_type = #tpu.core_type<tc>, window_params = [{transform_indices = @transform_0, window_bounds = array<i64: 1, 16, 16, 16>}, {pipeline_mode = #tpu.pipeline_mode<synchronous>, transform_indices = @transform_1, window_bounds = array<i64: 16, 4>}, {pipeline_mode = #tpu.pipeline_mode<synchronous>, transform_indices = @transform_2, window_bounds = array<i64: 1, 4>}, {pipeline_mode = #tpu.pipeline_mode<synchronous>, transform_indices = @transform_3, window_bounds = array<i64: 9, 4, 4>}, {pipeline_mode = #tpu.pipeline_mode<synchronous>, transform_indices = @transform_4, window_bounds = array<i64: 1, 4>}, {pipeline_mode = #tpu.pipeline_mode<synchronous>, transform_indices = @transform_5, window_bounds = array<i64: 4, 16>}, {pipeline_mode = #tpu.pipeline_mode<synchronous>, transform_indices = @transform_6, window_bounds = array<i64: 1, 16>}, {transform_indices = @transform_7, window_bounds = array<i64: 1, 16, 16, 16>}]} {
    %c0 = arith.constant 0 : index
    %c0_0 = arith.constant 0 : index
    %c0_1 = arith.constant 0 : index
    %c0_2 = arith.constant 0 : index
    %0 = vector.load %arg1[%c0, %c0_0, %c0_1, %c0_2] : memref<1x16x16x16xf32, #tpu.memory_space<vmem>>, vector<1x16x16x16xf32>
    %1 = vector.shape_cast %0 : vector<1x16x16x16xf32> to vector<256x16xf32>
    %2 = arith.truncf %1 : vector<256x16xf32> to vector<256x16xbf16>
    %c0_3 = arith.constant 0 : index
    %c0_4 = arith.constant 0 : index
    %3 = vector.load %arg2[%c0_3, %c0_4] : memref<16x4xbf16, #tpu.memory_space<vmem>>, vector<16x4xbf16>
    %cst = arith.constant dense<0.000000e+00> : vector<256x4xf32>
    %4 = tpu.matmul %2, %3, %cst {dimension_numbers = #tpu.dot_dimension_numbers<[1], [0], [0], [1], [0, 0, 1, 1], [], []>} : vector<256x16xbf16>, vector<16x4xbf16>, vector<256x4xf32> -> vector<256x4xf32>
    %c0_5 = arith.constant 0 : index
    %c0_6 = arith.constant 0 : index
    %5 = vector.load %arg3[%c0_5, %c0_6] : memref<1x4xf32, #tpu.memory_space<vmem>>, vector<1x4xf32>
    %6 = vector.broadcast %5 : vector<1x4xf32> to vector<256x4xf32>
    %7 = arith.addf %4, %6 : vector<256x4xf32>
    %cst_7 = arith.constant 0.000000e+00 : f32
    %8 = vector.broadcast %cst_7 : f32 to vector<256x4xf32>
    %9 = arith.maximumf %7, %8 : vector<256x4xf32>
    %cst_8 = arith.constant 0.000000e+00 : f32
    %10 = vector.broadcast %cst_8 : f32 to vector<16x4xf32>
    %cst_9 = arith.constant 0.000000e+00 : f32
    %11 = vector.broadcast %cst_9 : f32 to vector<16x4xf32>
    %12 = tpu.concatenate %10, %9, %11 in 0 : vector<16x4xf32>, vector<256x4xf32>, vector<16x4xf32> -> vector<288x4xf32>
    %13 = tpu.iota {dimensions = array<i32: 0>} : vector<288x1xi32>
    %c16_i32 = arith.constant 16 : i32
    %c0_i32 = arith.constant 0 : i32
    %14 = arith.cmpi eq, %c16_i32, %c0_i32 : i32
    %c1_i32 = arith.constant 1 : i32
    %15 = arith.select %14, %c1_i32, %c16_i32 : i32
    %16 = vector.broadcast %15 : i32 to vector<288x1xi32>
    %17 = arith.remsi %13, %16 : vector<288x1xi32>
    %c0_i32_10 = arith.constant 0 : i32
    %18 = vector.broadcast %c0_i32_10 : i32 to vector<288x1xi32>
    %19 = arith.cmpi ne, %17, %18 : vector<288x1xi32>
    %c0_i32_11 = arith.constant 0 : i32
    %20 = vector.broadcast %c0_i32_11 : i32 to vector<288x1xi32>
    %21 = arith.cmpi slt, %17, %20 : vector<288x1xi32>
    %c0_i32_12 = arith.constant 0 : i32
    %22 = arith.cmpi slt, %15, %c0_i32_12 : i32
    %23 = vector.broadcast %22 : i1 to vector<288x1xi1>
    %24 = vector.broadcast %23 : vector<288x1xi1> to vector<288x1xi1>
    %25 = arith.xori %21, %24 : vector<288x1xi1>
    %26 = arith.andi %25, %19 : vector<288x1xi1>
    %27 = vector.broadcast %15 : i32 to vector<288x1xi32>
    %28 = arith.addi %17, %27 : vector<288x1xi32>
    %29 = arith.select %26, %28, %17 : vector<288x1xi1>, vector<288x1xi32>
    %c1_i32_13 = arith.constant 1 : i32
    %30 = vector.broadcast %c1_i32_13 : i32 to vector<288x1xi32>
    %31 = arith.cmpi sge, %29, %30 : vector<288x1xi32>
    %c1_i32_14 = arith.constant 1 : i32
    %32 = tpu.dynamic_rotate %12 by %c1_i32_14 dim 0 : vector<288x4xf32>, i32 -> vector<288x4xf32>
    %cst_15 = arith.constant 0.000000e+00 : f32
    %33 = vector.shape_cast %31 : vector<288x1xi1> to vector<288x1xi1>
    %34 = vector.broadcast %33 : vector<288x1xi1> to vector<288x4xi1>
    %35 = vector.broadcast %cst_15 : f32 to vector<288x4xf32>
    %36 = arith.select %34, %32, %35 : vector<288x4xi1>, vector<288x4xf32>
    %c15_i32 = arith.constant 15 : i32
    %37 = vector.broadcast %c15_i32 : i32 to vector<288x1xi32>
    %38 = arith.cmpi slt, %29, %37 : vector<288x1xi32>
    %c287_i32 = arith.constant 287 : i32
    %39 = tpu.dynamic_rotate %12 by %c287_i32 dim 0 : vector<288x4xf32>, i32 -> vector<288x4xf32>
    %cst_16 = arith.constant 0.000000e+00 : f32
    %40 = vector.shape_cast %38 : vector<288x1xi1> to vector<288x1xi1>
    %41 = vector.broadcast %40 : vector<288x1xi1> to vector<288x4xi1>
    %42 = vector.broadcast %cst_16 : f32 to vector<288x4xf32>
    %43 = arith.select %41, %39, %42 : vector<288x4xi1>, vector<288x4xf32>
    %44 = arith.truncf %36 : vector<288x4xf32> to vector<288x4xbf16>
    %45 = arith.truncf %12 : vector<288x4xf32> to vector<288x4xbf16>
    %46 = arith.truncf %43 : vector<288x4xf32> to vector<288x4xbf16>
    %47 = vector.extract_strided_slice %44 {offsets = [0, 0], sizes = [256, 4], strides = [1, 1]} : vector<288x4xbf16> to vector<256x4xbf16>
    %c0_17 = arith.constant 0 : index
    %c0_18 = arith.constant 0 : index
    %c0_19 = arith.constant 0 : index
    %48 = vector.load %arg4[%c0_17, %c0_18, %c0_19] : memref<9x4x4xbf16, #tpu.memory_space<vmem>>, vector<1x4x4xbf16>
    %49 = vector.shape_cast %48 : vector<1x4x4xbf16> to vector<4x4xbf16>
    %cst_20 = arith.constant dense<0.000000e+00> : vector<256x4xf32>
    %50 = tpu.matmul %47, %49, %cst_20 {dimension_numbers = #tpu.dot_dimension_numbers<[1], [0], [0], [1], [0, 0, 1, 1], [], []>} : vector<256x4xbf16>, vector<4x4xbf16>, vector<256x4xf32> -> vector<256x4xf32>
    %51 = vector.extract_strided_slice %45 {offsets = [0, 0], sizes = [256, 4], strides = [1, 1]} : vector<288x4xbf16> to vector<256x4xbf16>
    %c1 = arith.constant 1 : index
    %c0_21 = arith.constant 0 : index
    %c0_22 = arith.constant 0 : index
    %52 = vector.load %arg4[%c1, %c0_21, %c0_22] : memref<9x4x4xbf16, #tpu.memory_space<vmem>>, vector<1x4x4xbf16>
    %53 = vector.shape_cast %52 : vector<1x4x4xbf16> to vector<4x4xbf16>
    %cst_23 = arith.constant dense<0.000000e+00> : vector<256x4xf32>
    %54 = tpu.matmul %51, %53, %cst_23 {dimension_numbers = #tpu.dot_dimension_numbers<[1], [0], [0], [1], [0, 0, 1, 1], [], []>} : vector<256x4xbf16>, vector<4x4xbf16>, vector<256x4xf32> -> vector<256x4xf32>
    %55 = arith.addf %50, %54 : vector<256x4xf32>
    %56 = vector.extract_strided_slice %46 {offsets = [0, 0], sizes = [256, 4], strides = [1, 1]} : vector<288x4xbf16> to vector<256x4xbf16>
    %c2 = arith.constant 2 : index
    %c0_24 = arith.constant 0 : index
    %c0_25 = arith.constant 0 : index
    %57 = vector.load %arg4[%c2, %c0_24, %c0_25] : memref<9x4x4xbf16, #tpu.memory_space<vmem>>, vector<1x4x4xbf16>
    %58 = vector.shape_cast %57 : vector<1x4x4xbf16> to vector<4x4xbf16>
    %cst_26 = arith.constant dense<0.000000e+00> : vector<256x4xf32>
    %59 = tpu.matmul %56, %58, %cst_26 {dimension_numbers = #tpu.dot_dimension_numbers<[1], [0], [0], [1], [0, 0, 1, 1], [], []>} : vector<256x4xbf16>, vector<4x4xbf16>, vector<256x4xf32> -> vector<256x4xf32>
    %60 = arith.addf %55, %59 : vector<256x4xf32>
    %61 = vector.extract_strided_slice %44 {offsets = [16, 0], sizes = [256, 4], strides = [1, 1]} : vector<288x4xbf16> to vector<256x4xbf16>
    %c3 = arith.constant 3 : index
    %c0_27 = arith.constant 0 : index
    %c0_28 = arith.constant 0 : index
    %62 = vector.load %arg4[%c3, %c0_27, %c0_28] : memref<9x4x4xbf16, #tpu.memory_space<vmem>>, vector<1x4x4xbf16>
    %63 = vector.shape_cast %62 : vector<1x4x4xbf16> to vector<4x4xbf16>
    %cst_29 = arith.constant dense<0.000000e+00> : vector<256x4xf32>
    %64 = tpu.matmul %61, %63, %cst_29 {dimension_numbers = #tpu.dot_dimension_numbers<[1], [0], [0], [1], [0, 0, 1, 1], [], []>} : vector<256x4xbf16>, vector<4x4xbf16>, vector<256x4xf32> -> vector<256x4xf32>
    %65 = arith.addf %60, %64 : vector<256x4xf32>
    %66 = vector.extract_strided_slice %45 {offsets = [16, 0], sizes = [256, 4], strides = [1, 1]} : vector<288x4xbf16> to vector<256x4xbf16>
    %c4 = arith.constant 4 : index
    %c0_30 = arith.constant 0 : index
    %c0_31 = arith.constant 0 : index
    %67 = vector.load %arg4[%c4, %c0_30, %c0_31] : memref<9x4x4xbf16, #tpu.memory_space<vmem>>, vector<1x4x4xbf16>
    %68 = vector.shape_cast %67 : vector<1x4x4xbf16> to vector<4x4xbf16>
    %cst_32 = arith.constant dense<0.000000e+00> : vector<256x4xf32>
    %69 = tpu.matmul %66, %68, %cst_32 {dimension_numbers = #tpu.dot_dimension_numbers<[1], [0], [0], [1], [0, 0, 1, 1], [], []>} : vector<256x4xbf16>, vector<4x4xbf16>, vector<256x4xf32> -> vector<256x4xf32>
    %70 = arith.addf %65, %69 : vector<256x4xf32>
    %71 = vector.extract_strided_slice %46 {offsets = [16, 0], sizes = [256, 4], strides = [1, 1]} : vector<288x4xbf16> to vector<256x4xbf16>
    %c5 = arith.constant 5 : index
    %c0_33 = arith.constant 0 : index
    %c0_34 = arith.constant 0 : index
    %72 = vector.load %arg4[%c5, %c0_33, %c0_34] : memref<9x4x4xbf16, #tpu.memory_space<vmem>>, vector<1x4x4xbf16>
    %73 = vector.shape_cast %72 : vector<1x4x4xbf16> to vector<4x4xbf16>
    %cst_35 = arith.constant dense<0.000000e+00> : vector<256x4xf32>
    %74 = tpu.matmul %71, %73, %cst_35 {dimension_numbers = #tpu.dot_dimension_numbers<[1], [0], [0], [1], [0, 0, 1, 1], [], []>} : vector<256x4xbf16>, vector<4x4xbf16>, vector<256x4xf32> -> vector<256x4xf32>
    %75 = arith.addf %70, %74 : vector<256x4xf32>
    %76 = vector.extract_strided_slice %44 {offsets = [32, 0], sizes = [256, 4], strides = [1, 1]} : vector<288x4xbf16> to vector<256x4xbf16>
    %c6 = arith.constant 6 : index
    %c0_36 = arith.constant 0 : index
    %c0_37 = arith.constant 0 : index
    %77 = vector.load %arg4[%c6, %c0_36, %c0_37] : memref<9x4x4xbf16, #tpu.memory_space<vmem>>, vector<1x4x4xbf16>
    %78 = vector.shape_cast %77 : vector<1x4x4xbf16> to vector<4x4xbf16>
    %cst_38 = arith.constant dense<0.000000e+00> : vector<256x4xf32>
    %79 = tpu.matmul %76, %78, %cst_38 {dimension_numbers = #tpu.dot_dimension_numbers<[1], [0], [0], [1], [0, 0, 1, 1], [], []>} : vector<256x4xbf16>, vector<4x4xbf16>, vector<256x4xf32> -> vector<256x4xf32>
    %80 = arith.addf %75, %79 : vector<256x4xf32>
    %81 = vector.extract_strided_slice %45 {offsets = [32, 0], sizes = [256, 4], strides = [1, 1]} : vector<288x4xbf16> to vector<256x4xbf16>
    %c7 = arith.constant 7 : index
    %c0_39 = arith.constant 0 : index
    %c0_40 = arith.constant 0 : index
    %82 = vector.load %arg4[%c7, %c0_39, %c0_40] : memref<9x4x4xbf16, #tpu.memory_space<vmem>>, vector<1x4x4xbf16>
    %83 = vector.shape_cast %82 : vector<1x4x4xbf16> to vector<4x4xbf16>
    %cst_41 = arith.constant dense<0.000000e+00> : vector<256x4xf32>
    %84 = tpu.matmul %81, %83, %cst_41 {dimension_numbers = #tpu.dot_dimension_numbers<[1], [0], [0], [1], [0, 0, 1, 1], [], []>} : vector<256x4xbf16>, vector<4x4xbf16>, vector<256x4xf32> -> vector<256x4xf32>
    %85 = arith.addf %80, %84 : vector<256x4xf32>
    %86 = vector.extract_strided_slice %46 {offsets = [32, 0], sizes = [256, 4], strides = [1, 1]} : vector<288x4xbf16> to vector<256x4xbf16>
    %c8 = arith.constant 8 : index
    %c0_42 = arith.constant 0 : index
    %c0_43 = arith.constant 0 : index
    %87 = vector.load %arg4[%c8, %c0_42, %c0_43] : memref<9x4x4xbf16, #tpu.memory_space<vmem>>, vector<1x4x4xbf16>
    %88 = vector.shape_cast %87 : vector<1x4x4xbf16> to vector<4x4xbf16>
    %cst_44 = arith.constant dense<0.000000e+00> : vector<256x4xf32>
    %89 = tpu.matmul %86, %88, %cst_44 {dimension_numbers = #tpu.dot_dimension_numbers<[1], [0], [0], [1], [0, 0, 1, 1], [], []>} : vector<256x4xbf16>, vector<4x4xbf16>, vector<256x4xf32> -> vector<256x4xf32>
    %90 = arith.addf %85, %89 : vector<256x4xf32>
    %c0_45 = arith.constant 0 : index
    %c0_46 = arith.constant 0 : index
    %91 = vector.load %arg5[%c0_45, %c0_46] : memref<1x4xf32, #tpu.memory_space<vmem>>, vector<1x4xf32>
    %92 = vector.broadcast %91 : vector<1x4xf32> to vector<256x4xf32>
    %93 = arith.addf %90, %92 : vector<256x4xf32>
    %cst_47 = arith.constant 0.000000e+00 : f32
    %94 = vector.broadcast %cst_47 : f32 to vector<256x4xf32>
    %95 = arith.maximumf %93, %94 : vector<256x4xf32>
    %96 = arith.truncf %95 : vector<256x4xf32> to vector<256x4xbf16>
    %c0_48 = arith.constant 0 : index
    %c0_49 = arith.constant 0 : index
    %97 = vector.load %arg6[%c0_48, %c0_49] : memref<4x16xbf16, #tpu.memory_space<vmem>>, vector<4x16xbf16>
    %cst_50 = arith.constant dense<0.000000e+00> : vector<256x16xf32>
    %98 = tpu.matmul %96, %97, %cst_50 {dimension_numbers = #tpu.dot_dimension_numbers<[1], [0], [0], [1], [0, 0, 1, 1], [], []>} : vector<256x4xbf16>, vector<4x16xbf16>, vector<256x16xf32> -> vector<256x16xf32>
    %c0_51 = arith.constant 0 : index
    %c0_52 = arith.constant 0 : index
    %99 = vector.load %arg7[%c0_51, %c0_52] : memref<1x16xf32, #tpu.memory_space<vmem>>, vector<1x16xf32>
    %100 = vector.broadcast %99 : vector<1x16xf32> to vector<256x16xf32>
    %101 = arith.addf %98, %100 : vector<256x16xf32>
    %102 = arith.addf %101, %1 : vector<256x16xf32>
    %cst_53 = arith.constant 0.000000e+00 : f32
    %103 = vector.broadcast %cst_53 : f32 to vector<256x16xf32>
    %104 = arith.maximumf %102, %103 : vector<256x16xf32>
    %105 = vector.shape_cast %104 : vector<256x16xf32> to vector<1x16x16x16xf32>
    %c0_54 = arith.constant 0 : index
    %c0_55 = arith.constant 0 : index
    %c0_56 = arith.constant 0 : index
    %c0_57 = arith.constant 0 : index
    %106 = vector.load %arg8[%c0_54, %c0_55, %c0_56, %c0_57] : memref<1x16x16x16xf32, #tpu.memory_space<vmem>>, vector<1x16x16x16xf32>
    tpu.vector_store %arg8[%c0_54, %c0_55, %c0_56, %c0_57], %105 {strides = array<i32>} : memref<1x16x16x16xf32, #tpu.memory_space<vmem>>, vector<1x16x16x16xf32>,
    return
  }
  func.func @transform_0(%arg0: i32) -> (i32, i32, i32, i32) {
    %c0_i32 = arith.constant 0 : i32
    %c0_i32_0 = arith.constant 0 : i32
    %c0_i32_1 = arith.constant 0 : i32
    %c0_i32_2 = arith.constant 0 : i32
    return %arg0, %c0_i32, %c0_i32_0, %c0_i32_1 : i32, i32, i32, i32
  }
  func.func @transform_1(%arg0: i32) -> (i32, i32) {
    %c0_i32 = arith.constant 0 : i32
    %c0_i32_0 = arith.constant 0 : i32
    %c0_i32_1 = arith.constant 0 : i32
    return %c0_i32, %c0_i32_0 : i32, i32
  }
  func.func @transform_2(%arg0: i32) -> (i32, i32) {
    %c0_i32 = arith.constant 0 : i32
    %c0_i32_0 = arith.constant 0 : i32
    %c0_i32_1 = arith.constant 0 : i32
    return %c0_i32, %c0_i32_0 : i32, i32
  }
  func.func @transform_3(%arg0: i32) -> (i32, i32, i32) {
    %c0_i32 = arith.constant 0 : i32
    %c0_i32_0 = arith.constant 0 : i32
    %c0_i32_1 = arith.constant 0 : i32
    %c0_i32_2 = arith.constant 0 : i32
    return %c0_i32, %c0_i32_0, %c0_i32_1 : i32, i32, i32
  }
  func.func @transform_4(%arg0: i32) -> (i32, i32) {
    %c0_i32 = arith.constant 0 : i32
    %c0_i32_0 = arith.constant 0 : i32
    %c0_i32_1 = arith.constant 0 : i32
    return %c0_i32, %c0_i32_0 : i32, i32
  }
  func.func @transform_5(%arg0: i32) -> (i32, i32) {
    %c0_i32 = arith.constant 0 : i32
    %c0_i32_0 = arith.constant 0 : i32
    %c0_i32_1 = arith.constant 0 : i32
    return %c0_i32, %c0_i32_0 : i32, i32
  }
  func.func @transform_6(%arg0: i32) -> (i32, i32) {
    %c0_i32 = arith.constant 0 : i32
    %c0_i32_0 = arith.constant 0 : i32
    %c0_i32_1 = arith.constant 0 : i32
    return %c0_i32, %c0_i32_0 : i32, i32
  }
  func.func @transform_7(%arg0: i32) -> (i32, i32, i32, i32) {
    %c0_i32 = arith.constant 0 : i32
    %c0_i32_0 = arith.constant 0 : i32
    %c0_i32_1 = arith.constant 0 : i32
    %c0_i32_2 = arith.constant 0 : i32
    return %arg0, %c0_i32, %c0_i32_0, %c0_i32_1 : i32, i32, i32, i32
  }
}

</mosaic_0001>

<bundles_post_ra>
// kernel: bottleneck_forward.1
= control target key start
LH: loop header
LB: loop body
LE: loop exit
PB: predicated region body
PF: predicated region fallthrough
CT: control target
= control target key end

     0   :  { %s4726_s24 = smov 0   ;;  %s6564_s0 = inlined_call_operand.vmem [shape: f32[2,16,16,16], index: 0, kind: input, shape index: {}]   ;;  %s6565_s1 = inlined_call_operand.vmem [shape: bf16[16,4], index: 1, kind: input, shape index: {}]   ;;  %s6566_s2 = inlined_call_operand.vmem [shape: f32[1,4], index: 2, kind: input, shape index: {}]   ;;  %s6567_s3 = inlined_call_operand.vmem [shape: bf16[9,4,4], index: 3, kind: input, shape index: {}]   ;;  %s6568_s4 = inlined_call_operand.vmem [shape: f32[1,4], index: 4, kind: input, shape index: {}]   ;;  %s6569_s5 = inlined_call_operand.vmem [shape: bf16[4,16], index: 5, kind: input, shape index: {}]   ;;  %s6570_s6 = inlined_call_operand.vmem [shape: f32[1,16], index: 6, kind: input, shape index: {}]   ;;  %s6571_s7 = inlined_call_operand.vmem [shape: f32[2,16,16,16], index: 7, kind: output, shape index: {}]  }
   0x1 LB: > { %s3863_s25 = sadd.s32 4294967295, %s4682_s24   ;;  %p3867_p0 = scmp.ge.s32.totalorder %s4682_s24, 1  ;;  %s4682_s24 = sphi %s4726_s24, %s17_s24  }
   0x2   : > { %p237_p1 = scmp.lt.s32.totalorder %s4682_s24, 3 }
   0x4   : > { %p238_p2 = pnand %p3867_p0, %p237_p1 }
   0x6   : > { %241 = sbr.rel (%p238_p2) target bundleno = 951 (0x3b7), region = 48 }
   0xb   : > { %v4643_v0 = vld [vmem:[%s6565_s1] sm:$0xff]   ;;  %p269_p3 = scmp.lt.s32.totalorder %s3863_s25, 1  ;;  %vm1579_vm0 = vcmask 1041408   ;;  %vm343_vm1 = vcmask 130048   ;;  %v6572_v52 = vmov 0.0|0.0   ;;  %v585_v56 = vlaneseq }
   0xc   : > { %v3890_v1 = vld [vmem:[%s6567_s3 + $0x2] sm:$0x3]  ;;  %4247 = vmatprep.subr.bf16.mxu0 %v4643_v0  ;;  %4621 = vmatprep.subr.bf16.mxu1 %v4643_v0  ;;  %v1527_v51 = vld [vmem:[%s6567_s3] sm:$0x3]  ;;  %v3921_v54 = vld [vmem:[%s6567_s3 + $0x4] sm:$0x3] }
   0xd   : > { %s6784_s25 = smov (!%p269_p3, %s3863_s25), 1  ;;  %4248 = vmatpush3.bf16.msra.mxu0 %v4643_v0  ;;  %4622 = vmatpush3.bf16.msra.mxu1 %v4643_v0  ;;  %v1581_v22 = vsel %vm1579_vm0, %v3890_v1, 0  ;;  %v1793_v53 = vsel %vm1579_vm0, %v1527_v51, 0  ;;  %v3938_v55 = vld [vmem:[%s6567_s3 + $0x6] sm:$0x3]  ;;  %v4815_v57 = vshrl.u32 %v585_v56, 7 }
   0xe   : > { %s4058_s30 = sshll.u32 %s6784_s25, 8  ;;  %4623 = vmatprep.subr.msk.bf16.mxu1 %vm1579_vm0, %v3890_v1  ;;  %4624 = vmatprep.subr.msk.bf16.mxu0 %vm1579_vm0, %v1527_v51  ;;  %v4820_v59 = vld [vmem:[%s6566_s2] ss:$0 sm:$0xff]  ;;  %vm1530_vm4 = vcmask 31744  }
   0xf   : > { %s4749_s10 = scalar_lea.vmem %s6564_s0, %s4058_s30  ;;  %v588_v61 = vadd.s32 16, %v4815_v57  ;;  %vm1122_vm2 = vcmp.lt.s32.totalorder %v4815_v57, 1  ;;  %vm1332_vm15 = vcmp.lt.s32.totalorder %v4815_v57, 7  ;;  %s6434_s18 = scalar_lea.vmem %s6571_s7, %s4058_s30 }
  0x10   : > { %v280_v2 = vld [vmem:[%s4749_s10] sm:$0xff]  ;;  %v281_v3 = vld [vmem:[%s4749_s10 + $0x8] sm:$0xff]  ;;  %v282_v4 = vld [vmem:[%s4749_s10 + $0x10] sm:$0xff] }
  0x11   : > { %v312_v5 = vpack.c.bf16 %v281_v3, %v280_v2  ;;  %v283_v6 = vld [vmem:[%s4749_s10 + $0x18] sm:$0xff]  ;;  %v284_v7 = vld [vmem:[%s4749_s10 + $0x20] sm:$0xff]  ;;  %v285_v8 = vld [vmem:[%s4749_s10 + $0x28] sm:$0xff]  ;;  %v640_v3 = vand.u32 15, %v588_v61 }
  0x12   : > { %v313_v9 = vpack.c.bf16 %v283_v6, %v282_v4  ;;  %v314_v10 = vpack.c.bf16 %v285_v8, %v284_v7  ;;  %v296_v11 = vld [vmem:[%s4749_s10 + $0x80] sm:$0xff]  ;;  %v297_v12 = vld [vmem:[%s4749_s10 + $0x88] sm:$0xff]  ;;  %v298_v13 = vld [vmem:[%s4749_s10 + $0x90] sm:$0xff] }
  0x13   : > { %4249 = vmatprep.mubr.msk.bf16.mxu0 %vm343_vm1, %v312_v5  ;;  %v286_v14 = vld [vmem:[%s4749_s10 + $0x30] sm:$0xff]  ;;  %v287_v15 = vld [vmem:[%s4749_s10 + $0x38] sm:$0xff]  ;;  %v320_v16 = vpack.c.bf16 %v297_v12, %v296_v11  ;;  %v288_v18 = vld [vmem:[%s4749_s10 + $0x40] sm:$0xff]  ;;  %vm4840_vm3 = vcmp.ge.s32.totalorder %v640_v3, 1 }
  0x14   : > { %4250 = vmatmul.mubr.msk.bf16.vlgmr.msra.gmra.mxu0 %vm343_vm1, %v313_v9  ;;  %v299_v17 = vld [vmem:[%s4749_s10 + $0x98] sm:$0xff]  ;;  %v289_v19 = vld [vmem:[%s4749_s10 + $0x48] sm:$0xff]  ;;  %v300_v21 = vld [vmem:[%s4749_s10 + $0xa0] sm:$0xff]  ;;  %v315_v24 = vpack.c.bf16 %v287_v15, %v286_v14  ;;  %v590_v9 = vadd.s32 32, %v4815_v57 }
  0x15   : > { %4253 = vmatprep.mubr.msk.bf16.mxu0 %vm343_vm1, %v314_v10  ;;  %v321_v20 = vpack.c.bf16 %v299_v17, %v298_v13  ;;  %4265 = vmatprep.mubr.msk.bf16.mxu1 %vm343_vm1, %v320_v16  ;;  %v301_v23 = vld [vmem:[%s4749_s10 + $0xa8] sm:$0xff]  ;;  %v316_v26 = vpack.c.bf16 %v289_v19, %v288_v18  ;;  %v302_v27 = vld [vmem:[%s4749_s10 + $0xb0] sm:$0xff]  ;;  %v303_v28 = vld [vmem:[%s4749_s10 + $0xb8] sm:$0xff]  ;;  %v596_v13 = vadd.s32 80, %v4815_v57 }
  0x16   : > { %v322_v25 = vpack.c.bf16 %v301_v23, %v300_v21  ;;  %v304_v29 = vld [vmem:[%s4749_s10 + $0xc0] sm:$0xff]  ;;  %v305_v30 = vld [vmem:[%s4749_s10 + $0xc8] sm:$0xff]  ;;  %v323_v31 = vpack.c.bf16 %v303_v28, %v302_v27  ;;  %v290_v32 = vld [vmem:[%s4749_s10 + $0x50] sm:$0xff]  ;;  %4316 = vmatpush3.bf16.msra.mxu0 %v1793_v53  ;;  %v654_v19 = vand.u32 15, %v590_v9  ;;  %v592_v28 = vadd.s32 48, %v4815_v57 }
  0x17   : > { %4266 = vmatmul.mubr.msk.bf16.vlgmr.msra.gmra.mxu1 %vm343_vm1, %v321_v20  ;;  %v291_v33 = vld [vmem:[%s4749_s10 + $0x58] sm:$0xff]  ;;  %v324_v34 = vpack.c.bf16 %v305_v30, %v304_v29  ;;  %v292_v35 = vld [vmem:[%s4749_s10 + $0x60] sm:$0xff]  ;;  %v293_v36 = vld [vmem:[%s4749_s10 + $0x68] sm:$0xff]  ;;  %4626 = vmatprep.subr.msk.bf16.mxu0 %vm1579_vm0, %v3938_v55 }
  0x18   : > { %4282 = vmatpush3.bf16.msra.mxu1 %v1581_v22  ;;  %4269 = vmatprep.mubr.msk.bf16.mxu1 %vm343_vm1, %v322_v25  ;;  %v317_v37 = vpack.c.bf16 %v291_v33, %v290_v32  ;;  %v318_v38 = vpack.c.bf16 %v293_v36, %v292_v35  ;;  %v306_v39 = vld [vmem:[%s4749_s10 + $0xd0] sm:$0xff]  ;;  %v307_v40 = vld [vmem:[%s4749_s10 + $0xd8] sm:$0xff]  ;;  %v308_v41 = vld [vmem:[%s4749_s10 + $0xe0] sm:$0xff]  ;;  %vm4892_vm5 = vcmp.ge.s32.totalorder %v654_v19, 1  ;;  %v668_v51 = vand.u32 15, %v592_v28 }
  0x19   : > { %v309_v42 = vld [vmem:[%s4749_s10 + $0xe8] sm:$0xff]  ;;  %v325_v43 = vpack.c.bf16 %v307_v40, %v306_v39  ;;  %v294_v44 = vld [vmem:[%s4749_s10 + $0x70] sm:$0xff]  ;;  %v295_v45 = vld [vmem:[%s4749_s10 + $0x78] sm:$0xff]  ;;  %4625 = vmatprep.subr.msk.bf16.mxu1 %vm1579_vm0, %v3921_v54  ;;  %v2208_v39 = vsel %vm1579_vm0, %v3938_v55, 0  ;;  %v598_v19 = vadd.s32 96, %v4815_v57 }
  0x1a   : > { %v326_v46 = vpack.c.bf16 %v309_v42, %v308_v41  ;;  %v319_v47 = vpack.c.bf16 %v295_v45, %v294_v44  ;;  %v310_v48 = vld [vmem:[%s4749_s10 + $0xf0] sm:$0xff]  ;;  %v311_v49 = vld [vmem:[%s4749_s10 + $0xf8] sm:$0xff]  ;;  %v4870_v29 = vld [vmem:[%s6567_s3 + $0x8] sm:$0x3]  ;;  %vm4944_vm6 = vcmp.ge.s32.totalorder %v668_v51, 1  ;;  %v696_v51 = vand.u32 15, %v596_v13 }
  0x1b   : > { %v327_v50 = vpack.c.bf16 %v311_v49, %v310_v48  ;;  %v4903_v45 = vld [vmem:[%s6567_s3 + $0xa] sm:$0x3] }
  0x1c   : > { %4254 = vmatmul.mubr.msk.bf16.gmra.mxu0 %vm343_vm1, %v315_v24  ;;  %v2007_v24 = vsel %vm1579_vm0, %v3921_v54, 0  ;;  %vm5021_vm8 = vcmp.ge.s32.totalorder %v696_v51, 1  ;;  %v5039_v51 = vadd.s32 160, %v4815_v57 }
  0x1d   : > { %4257 = vmatprep.mubr.msk.bf16.mxu0 %vm343_vm1, %v316_v26 }
  0x1f   : > { %4270 = vmatmul.mubr.msk.bf16.gmra.mxu1 %vm343_vm1, %v323_v31 }
  0x20   : > { %4273 = vmatprep.mubr.msk.bf16.mxu1 %vm343_vm1, %v324_v34  ;;  %v594_v34 = vadd.s32 64, %v4815_v57 }
  0x22   : > { %v682_v53 = vand.u32 15, %v594_v34 }
  0x24   : > { %4258 = vmatmul.mubr.msk.bf16.gmra.mxu0 %vm343_vm1, %v317_v37  ;;  %vm4948_vm7 = vcmp.ge.s32.totalorder %v682_v53, 1 }
  0x25   : > { %4261 = vmatprep.mubr.msk.bf16.mxu0 %vm343_vm1, %v318_v38 }
  0x27   : > { %4274 = vmatmul.mubr.msk.bf16.gmra.mxu1 %vm343_vm1, %v325_v43 }
  0x28   : > { %4277 = vmatprep.mubr.msk.bf16.mxu1 %vm343_vm1, %v326_v46 }
  0x2c   : > { %4262 = vmatmul.mubr.msk.bf16.gmra.mxu0 %vm343_vm1, %v319_v47 }
  0x2d   : > { %4317 = vmatprep.mubr.bf16.mxu0 %v6572_v52 }
  0x2f   : > { %4278 = vmatmul.mubr.msk.bf16.gmra.mxu1 %vm343_vm1, %v327_v50 }
  0x30   : > { %4283 = vmatprep.mubr.bf16.mxu1 %v6572_v52 }
  0xd4   : > { %v4251_v58 = vpop.f32.mrf.mxu0 }
  0xd5   : > { %v435_v6 = vadd.f32 %v4251_v58, %v4820_v59 }
  0xd6   : > { %v426_v60 = vpop.f32.mrf.mxu0 }
  0xd7   : > { %v427_v62 = vadd.f32 %v4820_v59, %v426_v60  ;;  %v4824_v0 = vpop.f32.mrf.mxu1  ;;  %v4848_v17 = vmax.f32 %v435_v6, 0.0 }
  0xd8   : > { %v4252_v63 = vpop.f32.mrf.mxu0 }
  0xd9   : > { %v4826_v1 = vmax.f32 %v427_v62, 0.0  ;;  %v438_v2 = vadd.f32 %v4252_v63, %v4820_v59  ;;  %v4829_v5 = vpop.f32.mrf.mxu1  ;;  %v1092_v36 = vrot.slane %v4848_v17, 7 }
  0xda   : > { %v429_v4 = vpop.f32.mrf.mxu0 }
  0xdb   : > { %v1090_v7 = vrot.slane %v4826_v1, 7  ;;  %v430_v8 = vadd.f32 %v4820_v59, %v429_v4  ;;  %v4836_v11 = vpop.f32.mrf.mxu1  ;;  %v4838_v12 = vmax.f32 %v438_v2, 0.0 }
  0xdc   : > { %v4255_v10 = vpop.f32.mrf.mxu0 }
  0xdd   : > { %v4844_v14 = vmax.f32 %v430_v8, 0.0  ;;  %v4846_v16 = vpop.f32.mrf.mxu1  ;;  %v1155_v18 = vsel %vm1122_vm2, 0.0, %v1090_v7  ;;  %v4863_v26 = vpack.c.bf16 %v4838_v12, %v4848_v17  ;;  %v451_v32 = vadd.f32 %v4255_v10, %v4820_v59 }
  0xde   : > { %v442_v15 = vpop.f32.mrf.mxu0  ;;  %v1230_v30 = vsel %vm4840_vm3, %v1155_v18, 0.0  ;;  %v1093_v37 = vrot.slane %v4838_v12, 7 }
  0xdf   : > { %v1091_v20 = vrot.slane %v4844_v14, 7  ;;  %v4855_v21 = vpack.c.bf16 %v4844_v14, %v4826_v1  ;;  %v443_v22 = vadd.f32 %v4820_v59, %v442_v15  ;;  %v4859_v25 = vpop.f32.mrf.mxu1  ;;  %6620 = vst [vmem:[#allocation3_spill] sm:$0xff] %v4863_v26  ;;  %v4911_v48 = vmax.f32 %v451_v32, 0.0 }
  0xe0   : > { %v4256_v23 = vpop.f32.mrf.mxu0  ;;  %v1152_v55 = vsel %vm1122_vm2, %v1092_v36, %v1093_v37 }
  0xe1   : > { %6619 = vst [vmem:[#allocation2_spill] sm:$0xff] %v4855_v21  ;;  %v454_v27 = vadd.f32 %v4256_v23, %v4820_v59  ;;  %v1154_v31 = vsel %vm1122_vm2, %v1090_v7, %v1091_v20  ;;  %4284 = vmatmul.mubr.msk.bf16.vlgmr.msra.gmra.mxu1 %vm1530_vm4, %v4855_v21  ;;  %v4880_v35 = vpop.f32.mrf.mxu1  ;;  %v4889_v40 = vmax.f32 %v443_v22, 0.0  ;;  %v1153_v47 = vsel %vm1122_vm2, %v1091_v20, %v1092_v36 }
  0xe2   : > { %v445_v33 = vpop.f32.mrf.mxu0  ;;  %v4884_v38 = vpack.c.bf16 %v1154_v31, %v1230_v30  ;;  %4350 = vmatpush3.bf16.msra.mxu1 %v2007_v24  ;;  %4287 = vmatprep.mubr.msk.bf16.mxu1 %vm1530_vm4, %v4863_v26  ;;  %v1232_v56 = vsel %vm4892_vm5, %v1153_v47, 0.0  ;;  %v1096_v7 = vrot.slane %v4911_v48, 7  ;;  %v600_v20 = vadd.s32 112, %v4815_v57 }
  0xe3   : > { %v446_v41 = vadd.f32 %v4820_v59, %v445_v33  ;;  %v4896_v44 = vpop.f32.mrf.mxu1  ;;  %4627 = vmatprep.subr.msk.bf16.mxu1 %vm1579_vm0, %v4870_v29  ;;  %v4905_v46 = vmax.f32 %v454_v27, 0.0  ;;  %v1094_v58 = vrot.slane %v4889_v40, 7  ;;  %v4929_v62 = vpack.c.bf16 %v1152_v55, %v1232_v56 }
  0xe4   : > { %v4259_v42 = vpop.f32.mrf.mxu0  ;;  %4318 = vmatmul.mubr.msk.bf16.vlgmr.msra.gmra.mxu0 %vm1530_vm4, %v4884_v38  ;;  %v4969_v31 = vadd.s32 24, %v4815_v57  ;;  %v710_v56 = vand.u32 15, %v598_v19 }
  0xe5   : > { %v4913_v49 = vmax.f32 %v446_v41, 0.0  ;;  %v4915_v54 = vpop.f32.mrf.mxu1  ;;  %4384 = vmatpush3.bf16.msra.mxu0 %v2208_v39  ;;  %v4935_v3 = vpack.c.bf16 %v4905_v46, %v4911_v48  ;;  %4321 = vmatprep.mubr.msk.bf16.mxu0 %vm1530_vm4, %v4929_v62  ;;  %v467_v15 = vadd.f32 %v4259_v42, %v4820_v59  ;;  %v1097_v22 = vrot.slane %v4905_v46, 7 }
  0xe6   : > { %v458_v50 = vpop.f32.mrf.mxu0  ;;  %4628 = vmatprep.subr.msk.bf16.mxu0 %vm1579_vm0, %v4903_v45  ;;  %v1151_v27 = vsel %vm1122_vm2, %v1093_v37, %v1094_v58  ;;  %v602_v41 = vadd.s32 128, %v4815_v57  ;;  %v4983_v42 = vadd.s32 8, %v4815_v57  ;;  %vm5025_vm9 = vcmp.ge.s32.totalorder %v710_v56, 1 }
  0xe7   : > { %v1095_v60 = vrot.slane %v4913_v49, 7  ;;  %v4927_v61 = vpack.c.bf16 %v4913_v49, %v4889_v40  ;;  %v4931_v2 = vpop.f32.mrf.mxu1  ;;  %6624 = vst [vmem:[#allocation5_spill] sm:$0xff] %v4935_v3  ;;  %v459_v4 = vadd.f32 %v4820_v59, %v458_v50  ;;  %v1234_v36 = vsel %vm4944_vm6, %v1151_v27, 0.0 }
  0xe8   : > { %v4260_v63 = vpop.f32.mrf.mxu0  ;;  %v4985_v43 = vmax.f32 %v467_v15, 0.0  ;;  %v1148_v53 = vsel %vm1122_vm2, %v1096_v7, %v1097_v22  ;;  %v738_v15 = vand.u32 15, %v602_v41  ;;  %v494_v27 = vadd.f32 %v4820_v59, %v4846_v16 }
  0xe9   : > { %6623 = vst [vmem:[#allocation4_spill] sm:$0xff] %v4927_v61  ;;  %v470_v6 = vadd.f32 %v4260_v63, %v4820_v59  ;;  %4288 = vmatmul.mubr.msk.bf16.gmra.mxu1 %vm1530_vm4, %v4927_v61  ;;  %v1150_v24 = vsel %vm1122_vm2, %v1094_v58, %v1095_v60  ;;  %v1149_v28 = vsel %vm1122_vm2, %v1095_v60, %v1096_v7  ;;  %v4966_v30 = vpop.f32.mrf.mxu1  ;;  %v4971_v32 = vmax.f32 %v459_v4, 0.0 }
  0xea   : > { %v461_v8 = vpop.f32.mrf.mxu0  ;;  %4291 = vmatprep.mubr.msk.bf16.mxu1 %vm1530_vm4, %v4935_v3  ;;  %v1236_v37 = vsel %vm4948_vm7, %v1149_v28, 0.0  ;;  %v4991_v50 = vpack.c.bf16 %v1150_v24, %v1234_v36  ;;  %v724_v60 = vand.u32 15, %v600_v20  ;;  %v604_v63 = vadd.s32 144, %v4815_v57 }
  0xeb   : > { %v462_v18 = vadd.f32 %v4820_v59, %v461_v8  ;;  %v4973_v33 = vmax.f32 %v470_v6, 0.0  ;;  %v4995_v58 = vpop.f32.mrf.mxu1  ;;  %v1098_v4 = vrot.slane %v4971_v32, 7  ;;  %v5005_v8 = vpack.c.bf16 %v1148_v53, %v1236_v37 }
  0xec   : > { %v4263_v23 = vpop.f32.mrf.mxu0  ;;  %4322 = vmatmul.mubr.msk.bf16.gmra.mxu0 %vm1530_vm4, %v4991_v50  ;;  %vm5034_vm10 = vcmp.ge.s32.totalorder %v724_v60, 1  ;;  %vm5045_vm11 = vcmp.ge.s32.totalorder %v738_v15, 1  ;;  %v491_v60 = vadd.f32 %v4820_v59, %v4829_v5  ;;  %v499_v37 = vadd.f32 %v4824_v0, %v4820_v59 }
  0xed   : > { %v4975_v34 = vmax.f32 %v462_v18, 0.0  ;;  %v5001_v6 = vpack.c.bf16 %v4973_v33, %v4985_v43  ;;  %4325 = vmatprep.mubr.msk.bf16.mxu0 %vm1530_vm4, %v5005_v8  ;;  %v483_v24 = vadd.f32 %v4263_v23, %v4820_v59  ;;  %v5029_v36 = vpop.f32.mrf.mxu1  ;;  %v752_v23 = vand.u32 15, %v604_v63 }
  0xee   : > { %v474_v39 = vpop.f32.mrf.mxu0  ;;  %v5064_v18 = vadd.s32 176, %v4815_v57  ;;  %v515_v41 = vadd.f32 %v4859_v25, %v4820_v59 }
  0xef   : > { %v4989_v47 = vpack.c.bf16 %v4975_v34, %v4971_v32  ;;  %6630 = vst [vmem:[#allocation7_spill] sm:$0xff] %v5001_v6  ;;  %v475_v7 = vadd.f32 %v4820_v59, %v474_v39  ;;  %v1099_v9 = vrot.slane %v4975_v34, 7  ;;  %v1147_v39 = vsel %vm1122_vm2, %v1097_v22, %v1098_v4  ;;  %v4279_v15 = vpop.f32.mrf.mxu1 }
  0xf0   : > { %v4264_v55 = vpop.f32.mrf.mxu0  ;;  %v1101_v22 = vrot.slane %v4973_v33, 7  ;;  %v5059_v52 = vmax.f32 %v483_v24, 0.0  ;;  %v502_v24 = vadd.f32 %v4836_v11, %v4820_v59  ;;  %vm5097_vm12 = vcmp.ge.s32.totalorder %v752_v23, 1 }
  0xf1   : > { %6629 = vst [vmem:[#allocation6_spill] sm:$0xff] %v4989_v47  ;;  %v486_v10 = vadd.f32 %v4264_v55, %v4820_v59  ;;  %4292 = vmatmul.mubr.msk.bf16.gmra.mxu1 %vm1530_vm4, %v4989_v47  ;;  %v5015_v19 = vmax.f32 %v475_v7, 0.0  ;;  %v1146_v55 = vsel %vm1122_vm2, %v1098_v4, %v1099_v9  ;;  %v5050_v7 = vadd.s32 272, %v4815_v57 }
  0xf2   : > { %v477_v13 = vpop.f32.mrf.mxu0  ;;  %4295 = vmatprep.mubr.msk.bf16.mxu1 %vm1530_vm4, %v5001_v6  ;;  %v1238_v4 = vsel %vm5021_vm8, %v1147_v39, 0.0  ;;  %v5085_v47 = vmax.f32 %v491_v60, 0.0 }
  0xf3   : > { %v478_v20 = vadd.f32 %v4820_v59, %v477_v13  ;;  %v5041_v53 = vmax.f32 %v486_v10, 0.0  ;;  %v1102_v63 = vrot.slane %v5015_v19, 7  ;;  %v1100_v10 = vrot.slane %v4985_v43, 7 }
  0xf4   : > { %v5073_v6 = vpack.c.bf16 %v1146_v55, %v1238_v4 }
  0xf5   : > { %v5056_v13 = vmax.f32 %v478_v20, 0.0  ;;  %v5081_v39 = vpack.c.bf16 %v5041_v53, %v5059_v52  ;;  %v1145_v0 = vsel %vm1122_vm2, %v1099_v9, %v1100_v10  ;;  %v1144_v55 = vsel %vm1122_vm2, %v1100_v10, %v1101_v22  ;;  %v5108_v10 = vpop.f32.mrf.mxu1 }
  0xf6   : > { %4326 = vmatmul.mubr.msk.bf16.gmra.mxu0 %vm1530_vm4, %v5073_v6  ;;  %v1240_v11 = vsel %vm5025_vm9, %v1145_v0, 0.0  ;;  %v1143_v16 = vsel %vm1122_vm2, %v1101_v22, %v1102_v63  ;;  %v1104_v9 = vrot.slane %v5059_v52, 7  ;;  %v766_v0 = vand.u32 15, %v5039_v51 }
  0xf7   : > { %v1103_v5 = vrot.slane %v5056_v13, 7  ;;  %v5071_v20 = vpack.c.bf16 %v5056_v13, %v5015_v19  ;;  %6640 = vst [vmem:[#allocation9_spill] sm:$0xff] %v5081_v39  ;;  %v5102_v60 = vpack.c.bf16 %v1144_v55, %v1240_v11  ;;  %v1105_v23 = vrot.slane %v5041_v53, 7  ;;  %v4280_v3 = vpop.f32.mrf.mxu1 }
  0xf8   : > { %v864_v22 = vand.u32 15, %v5050_v7  ;;  %v5116_v55 = vmax.f32 %v502_v24, 0.0  ;;  %v5118_v11 = vmax.f32 %v494_v27, 0.0  ;;  %v1106_v51 = vrot.slane %v5085_v47, 7 }
  0xf9   : > { %6639 = vst [vmem:[#allocation8_spill] sm:$0xff] %v5071_v20  ;;  %4296 = vmatmul.mubr.msk.bf16.gmra.mxu1 %vm1530_vm4, %v5071_v20  ;;  %v1142_v28 = vsel %vm1122_vm2, %v1102_v63, %v1103_v5  ;;  %v5111_v20 = vmax.f32 %v499_v37, 0.0  ;;  %4329 = vmatprep.mubr.msk.bf16.mxu0 %vm1530_vm4, %v5102_v60  ;;  %v1242_v63 = vsel %vm5034_vm10, %v1143_v16, 0.0  ;;  %v1141_v37 = vsel %vm1122_vm2, %v1103_v5, %v1104_v9 }
  0xfa   : > { %4299 = vmatprep.mubr.msk.bf16.mxu1 %vm1530_vm4, %v5081_v39  ;;  %v507_v7 = vadd.f32 %v4820_v59, %v4880_v35  ;;  %v5129_v39 = vpack.c.bf16 %v1142_v28, %v1242_v63  ;;  %v610_v24 = vadd.s32 192, %v4815_v57  ;;  %v5134_v27 = vpack.c.bf16 %v5118_v11, %v5085_v47 }
  0xfb   : > { %v518_v16 = vadd.f32 %v4896_v44, %v4820_v59  ;;  %v510_v5 = vadd.f32 %v4820_v59, %v4915_v54  ;;  %v1140_v35 = vsel %vm1122_vm2, %v1104_v9, %v1105_v23  ;;  %v1244_v28 = vsel %vm5045_vm11, %v1141_v37, 0.0 }
  0xfc   : > { %6643 = vst [vmem:[#allocation10_spill] sm:$0xff] %v5129_v39  ;;  %6644 = vst [vmem:[#allocation11_spill] sm:$0xff] %v5134_v27  ;;  %v547_v63 = vadd.f32 %v4279_v15, %v4820_v59  ;;  %v550_v61 = vadd.f32 %v4280_v3, %v4820_v59  ;;  %v1108_v26 = vrot.slane %v5111_v20, 7  ;;  %v5151_v25 = vpack.c.bf16 %v5116_v55, %v5111_v20 }
  0xfd   : > { %v1107_v44 = vrot.slane %v5118_v11, 7  ;;  %v5154_v54 = vpack.c.bf16 %v1140_v35, %v1244_v28  ;;  %v1109_v21 = vrot.slane %v5116_v55, 7  ;;  %v5157_v9 = vmax.f32 %v507_v7, 0.0 }
  0xfe   : > { %6645 = vst [vmem:[#allocation12_spill] sm:$0xff] %v5151_v25  ;;  %4330 = vmatmul.mubr.msk.bf16.gmra.mxu0 %vm1530_vm4, %v5129_v39  ;;  %v5161_v56 = vmax.f32 %v547_v63, 0.0  ;;  %v5165_v3 = vmax.f32 %v550_v61, 0.0  ;;  %v5167_v15 = vmax.f32 %v515_v41, 0.0  ;;  %vm5173_vm13 = vcmp.ge.s32.totalorder %v864_v22, 1 }
  0xff   : > { %6646 = vst [vmem:[#allocation13_spill] sm:$0xff] %v5154_v54  ;;  %4333 = vmatprep.mubr.msk.bf16.mxu0 %vm1530_vm4, %v5154_v54  ;;  %v1139_v7 = vsel %vm1122_vm2, %v1105_v23, %v1106_v51  ;;  %vm5179_vm14 = vcmp.ge.s32.totalorder %v766_v0, 1  ;;  %v5183_v61 = vmax.f32 %v518_v16, 0.0  ;;  %v5185_v41 = vmax.f32 %v510_v5, 0.0 }
 0x100   : > { %6647 = vst [vmem:[#allocation14_spill] sm:$0xff] %v5167_v15  ;;  %v794_v28 = vand.u32 15, %v610_v24  ;;  %v612_v63 = vadd.s32 208, %v4815_v57  ;;  %v5191_v22 = vpack.c.bf16 %v5165_v3, %v5161_v56  ;;  %v1138_v23 = vsel %vm1122_vm2, %v1106_v51, %v1107_v44 }
 0x101   : > { %4300 = vmatmul.mubr.msk.bf16.gmra.mxu1 %vm1530_vm4, %v5134_v27  ;;  %v1246_v0 = vsel %vm5097_vm12, %v1139_v7, 0.0  ;;  %v1110_v16 = vrot.slane %v5157_v9, 7  ;;  %v523_v5 = vadd.f32 %v4820_v59, %v4966_v30  ;;  %v1136_v24 = vsel %vm1122_vm2, %v1108_v26, %v1109_v21 }
 0x102   : > { %4303 = vmatprep.mubr.msk.bf16.mxu1 %vm1530_vm4, %v5151_v25  ;;  %6652 = vst [vmem:[#allocation15_spill] sm:$0xff] %v5191_v22  ;;  %v1137_v25 = vsel %vm1122_vm2, %v1107_v44, %v1108_v26  ;;  %v1112_v22 = vrot.slane %v5167_v15, 7  ;;  %v531_v51 = vadd.f32 %v4931_v2, %v4820_v59  ;;  %v6653_v4 = vrot.slane %v5165_v3, 7 }
 0x103   : > { %v1248_v30 = vsel %vm5179_vm14, %v1137_v25, 0.0  ;;  %v5216_v27 = vpack.c.bf16 %v5183_v61, %v5167_v15  ;;  %v5220_v26 = vpack.c.bf16 %v5185_v41, %v5157_v9  ;;  %v534_v44 = vadd.f32 %v4995_v58, %v4820_v59 }
 0x104   : > { %v1123_v7 = vsel %vm1122_vm2, %v6653_v4, 0.0  ;;  %v5224_v2 = vpack.c.bf16 %v1138_v23, %v1246_v0  ;;  %v1111_v54 = vrot.slane %v5185_v41, 7  ;;  %v526_v4 = vadd.f32 %v4820_v59, %v5029_v36 }
 0x105   : > { %6654 = vst [vmem:[#allocation16_spill] sm:$0xff] %v5216_v27  ;;  %6655 = vst [vmem:[#allocation17_spill] sm:$0xff] %v5220_v26  ;;  %v1262_v25 = vsel %vm5173_vm13, %v1123_v7, 0.0  ;;  %v5231_v35 = vpack.c.bf16 %v1136_v24, %v1248_v30  ;;  %v1113_v15 = vrot.slane %v5183_v61, 7  ;;  %v5234_v39 = vmax.f32 %v523_v5, 0.0 }
 0x106   : > { %6656 = vst [vmem:[#allocation18_spill] sm:$0xff] %v5224_v2  ;;  %4334 = vmatmul.mubr.msk.bf16.gmra.mxu0 %vm1530_vm4, %v5224_v2  ;;  %v6659_v58 = vand.u32 15, %v5064_v18  ;;  %v1135_v36 = vsel %vm1122_vm2, %v1109_v21, %v1110_v16  ;;  %v6662_v37 = vand.u32 15, %v4983_v42  ;;  %v5254_v5 = vmax.f32 %v531_v51, 0.0 }
 0x107   : > { %6657 = vst [vmem:[#allocation19_spill] sm:$0xff] %v5231_v35  ;;  %6658 = vst [vmem:[#allocation20_spill] sm:$0xff] %v5234_v39  ;;  %4337 = vmatprep.mubr.msk.bf16.mxu0 %vm1530_vm4, %v5231_v35  ;;  %vm5260_vm6 = vcmp.ge.s32.totalorder %v794_v28, 1  ;;  %v1133_v21 = vsel %vm1122_vm2, %v1111_v54, %v1112_v22  ;;  %v614_v42 = vadd.s32 224, %v4815_v57  ;;  %v808_v7 = vand.u32 15, %v612_v63 }
 0x108   : > { %vm5242_vm3 = vcmp.ge.s32.totalorder %v6659_v58, 1  ;;  %vm5250_vm5 = vcmp.lt.s32.totalorder %v6662_v37, 15  ;;  %v4685_v51 = vmov 0.0   ;;  %v5271_v58 = vadd.s32 40, %v4815_v57 }
 0x109   : > { %4304 = vmatmul.mubr.msk.bf16.gmra.mxu1 %vm1530_vm4, %v5220_v26  ;;  %v5268_v30 = vpack.c.bf16 %v4685_v51, %v1262_v25  ;;  %v5273_v37 = vmax.f32 %v534_v44, 0.0  ;;  %v5275_v28 = vmax.f32 %v526_v4, 0.0  ;;  %v1134_v26 = vsel %vm1122_vm2, %v1110_v16, %v1111_v54 }
 0x10a   : > { %4307 = vmatprep.mubr.msk.bf16.mxu1 %vm1530_vm4, %v5216_v27  ;;  %v541_v27 = vpop.f32.mrf.mxu1  ;;  %v1250_v35 = vsel %vm5242_vm3, %v1135_v36, 0.0  ;;  %v1114_v24 = vrot.slane %v5234_v39, 7  ;;  %v539_v63 = vadd.f32 %v4820_v59, %v5108_v10  ;;  %v1132_v25 = vsel %vm1122_vm2, %v1112_v22, %v1113_v15 }
 0x10b   : > { %6667 = vst [vmem:[#allocation21_spill] sm:$0xff] %v5268_v30  ;;  %6668 = vst [vmem:[#allocation22_spill] sm:$0xff] %v5273_v37  ;;  %v1252_v44 = vsel %vm5260_vm6, %v1133_v21, 0.0  ;;  %v1116_v4 = vrot.slane %v5254_v5, 7  ;;  %v822_v30 = vand.u32 15, %v614_v42  ;;  %v616_v2 = vadd.s32 240, %v4815_v57 }
 0x10c   : > { %v618_v54 = vadd.s32 256, %v4815_v57  ;;  %v6669_v16 = vand.u32 15, %v4969_v31  ;;  %v5299_v10 = vpack.c.bf16 %v5275_v28, %v5234_v39  ;;  %v542_v22 = vadd.f32 %v4820_v59, %v541_v27 }
 0x10d   : > { %v5302_v36 = vpack.c.bf16 %v1134_v26, %v1250_v35  ;;  %v619_v18 = vadd.s32 264, %v4815_v57  ;;  %v5307_v21 = vpack.c.bf16 %v5273_v37, %v5254_v5  ;;  %v1115_v31 = vrot.slane %v5275_v28, 7 }
 0x10e   : > { %vm5293_vm7 = vcmp.lt.s32.totalorder %v6669_v16, 15  ;;  %6672 = vst [vmem:[#allocation23_spill] sm:$0xff] %v5299_v10  ;;  %v5310_v42 = vpack.c.bf16 %v1132_v25, %v1252_v44  ;;  %vm5312_vm8 = vcmp.ge.s32.totalorder %v808_v7, 1  ;;  %v6678_v39 = vrot.slane %v4826_v1, 1 }
 0x10f   : > { %6673 = vst [vmem:[#allocation24_spill] sm:$0xff] %v5302_v36  ;;  %6674 = vst [vmem:[#allocation25_spill] sm:$0xff] %v5307_v21  ;;  %v1117_v27 = vrot.slane %v5273_v37, 7  ;;  %v5321_v26 = vmax.f32 %v539_v63, 0.0  ;;  %4338 = vmatmul.mubr.msk.bf16.gmra.mxu0 %vm1530_vm4, %v5302_v36  ;;  %v1131_v35 = vsel %vm1122_vm2, %v1113_v15, %v1114_v24  ;;  %v1301_v7 = vrot.slane %v4844_v14, 1 }
 0x110   : > { %6675 = vst [vmem:[#allocation26_spill] sm:$0xff] %v5310_v42  ;;  %v1365_v59 = vsel %vm1332_vm15, 0.0, %v6678_v39  ;;  %4341 = vmatprep.mubr.msk.bf16.mxu0 %vm1530_vm4, %v5310_v42  ;;  %vm5334_vm9 = vcmp.ge.s32.totalorder %v822_v30, 1  ;;  %v1129_v63 = vsel %vm1122_vm2, %v1115_v31, %v1116_v4  ;;  %v836_v25 = vand.u32 15, %v616_v2 }
 0x111   : > { %4308 = vmatmul.mubr.msk.bf16.gmra.mxu1 %vm1530_vm4, %v5299_v10  ;;  %v5340_v44 = vmax.f32 %v542_v22, 0.0  ;;  %v661_v15 = vand.u32 15, %v5271_v58  ;;  %v850_v10 = vand.u32 15, %v618_v54  ;;  %v857_v14 = vand.u32 15, %v619_v18 }
 0x112   : > { %4311 = vmatprep.mubr.msk.bf16.mxu1 %vm1530_vm4, %v5307_v21  ;;  %v1302_v36 = vrot.slane %v4848_v17, 1  ;;  %v1130_v42 = vsel %vm1122_vm2, %v1114_v24, %v1115_v31  ;;  %v1254_v30 = vsel %vm5312_vm8, %v1131_v35, 0.0  ;;  %v1439_v21 = vsel %vm5250_vm5, %v1365_v59, 0.0 }
 0x113   : > { %v1118_v37 = vrot.slane %v5321_v26, 7  ;;  %v1331_v2 = vrot.slane %v5165_v3, 1  ;;  %v1128_v58 = vsel %vm1122_vm2, %v1116_v4, %v1117_v27  ;;  %v1256_v54 = vsel %vm5334_vm9, %v1129_v63, 0.0 }
 0x114   : > { %v1363_v17 = vsel %vm1332_vm15, %v1301_v7, %v1302_v36  ;;  %v1304_v24 = vrot.slane %v4889_v40, 1  ;;  %vm5359_vm10 = vcmp.ge.s32.totalorder %v836_v25, 1  ;;  %v593_v0 = vadd.s32 56, %v4815_v57 }
 0x115   : > { %v1120_v18 = vrot.slane %v5161_v56, 7  ;;  %v1119_v31 = vrot.slane %v5340_v44, 7  ;;  %v5368_v4 = vpack.c.bf16 %v5340_v44, %v5321_v26  ;;  %v5370_v16 = vpack.c.bf16 %v1130_v42, %v1254_v30 }
 0x116   : > { %v1330_v59 = vrot.slane %v5161_v56, 1  ;;  %v5373_v35 = vpack.c.bf16 %v1128_v58, %v1256_v54  ;;  %v1509_v40 = vpack.c.bf16 %v1439_v21, %v4685_v51  ;;  %vm5375_vm11 = vcmp.ge.s32.totalorder %v850_v10, 1  ;;  %v6714_v56 = vld [vmem:[#allocation2_spill] sm:$0xff] }
 0x117   : > { %v1303_v63 = vrot.slane %v4838_v12, 1  ;;  %v1333_v25 = vsel %vm1332_vm15, %v1331_v2, 0.0  ;;  %4342 = vmatmul.mubr.msk.bf16.gmra.mxu0 %vm1530_vm4, %v5370_v16  ;;  %v1127_v42 = vsel %vm1122_vm2, %v1117_v27, %v1118_v37  ;;  %vm5388_vm12 = vcmp.lt.s32.totalorder %v857_v14, 15 }
 0x118   : > { %v6687_v10 = vrot.slane %v4826_v1, 1  ;;  %v1441_v21 = vsel %vm5293_vm7, %v1363_v17, 0.0  ;;  %4345 = vmatprep.mubr.msk.bf16.mxu0 %vm1530_vm4, %v5373_v35  ;;  %vm5401_vm13 = vcmp.lt.s32.totalorder %v661_v15, 15  ;;  %v595_v27 = vadd.s32 72, %v4815_v57 }
 0x119   : > { %4312 = vmatmul.mubr.msk.bf16.gmra.mxu1 %vm1530_vm4, %v5368_v4  ;;  %v1126_v1 = vsel %vm1122_vm2, %v1118_v37, %v1119_v31  ;;  %v6690_v23 = vrot.slane %v5165_v3, 7  ;;  %v1125_v58 = vsel %vm1122_vm2, %v1119_v31, %v1120_v18  ;;  %v1258_v15 = vsel %vm5359_vm10, %v1127_v42, 0.0 }
 0x11a   : > { %v1364_v12 = vsel %vm1332_vm15, %v6687_v10, %v1301_v7  ;;  %4351 = vmatprep.mubr.msk.bf16.mxu1 %vm1530_vm4, %v1509_v40  ;;  %v1361_v7 = vsel %vm1332_vm15, %v1303_v63, %v1304_v24  ;;  %v1260_v54 = vsel %vm5375_vm11, %v1125_v58, 0.0  ;;  %v1334_v37 = vsel %vm1332_vm15, %v1330_v59, %v1331_v2 }
 0x11b   : > { %v1124_v14 = vsel %vm1122_vm2, %v1120_v18, %v6690_v23  ;;  %v1471_v3 = vsel %vm5388_vm12, %v1333_v25, 0.0  ;;  %v1305_v17 = vrot.slane %v4913_v49, 1  ;;  %v675_v40 = vand.u32 15, %v593_v0 }
 0x11c   : > { %v5427_v10 = vpack.c.bf16 %v1124_v14, %v1260_v54  ;;  %v5429_v18 = vpack.c.bf16 %v1471_v3, %v1334_v37  ;;  %v1308_v22 = vrot.slane %v4971_v32, 1  ;;  %v1443_v31 = vsel %vm5401_vm13, %v1361_v7, 0.0  ;;  %v5447_v32 = vld [vmem:[%s6567_s3 + $0xc] sm:$0x3]  ;;  %v5507_v3 = vld [vmem:[%s6567_s3 + $0xe] sm:$0x3] }
 0x11d   : > { %v689_v39 = vand.u32 15, %v595_v27  ;;  %v5434_v42 = vpack.c.bf16 %v1441_v21, %v1364_v12  ;;  %v1306_v2 = vrot.slane %v4911_v48, 1  ;;  %v5437_v23 = vpack.c.bf16 %v1126_v1, %v1258_v15 }
 0x11e   : > { %v2409_v49 = vsel %vm1579_vm0, %v4870_v29, 0  ;;  %v1307_v0 = vrot.slane %v4905_v46, 1  ;;  %v1362_v25 = vsel %vm1332_vm15, %v1302_v36, %v1303_v63  ;;  %vm5455_vm2 = vcmp.lt.s32.totalorder %v675_v40, 15 }
 0x11f   : > { %4346 = vmatmul.mubr.msk.bf16.gmra.mxu0 %vm1530_vm4, %v5437_v23  ;;  %v5453_v48 = vpack.c.bf16 %v1443_v31, %v1362_v25  ;;  %v1359_v46 = vsel %vm1332_vm15, %v1305_v17, %v1306_v2  ;;  %v597_v36 = vadd.s32 88, %v4815_v57  ;;  %vm5464_vm14 = vcmp.lt.s32.totalorder %v689_v39, 15 }
 0x120   : > { %4385 = vmatprep.mubr.msk.bf16.mxu0 %vm1530_vm4, %v4884_v38  ;;  %v1357_v51 = vsel %vm1332_vm15, %v1307_v0, %v1308_v22  ;;  %v599_v12 = vadd.s32 104, %v4815_v57  ;;  %v1360_v21 = vsel %vm1332_vm15, %v1304_v24, %v1305_v17  ;;  %v1445_v38 = vsel %vm5455_vm2, %v1359_v46, 0.0 }
 0x121   : > { %4352 = vmatmul.mubr.msk.bf16.vlgmr.msra.gmra.mxu1 %vm1530_vm4, %v5434_v42  ;;  %v1309_v30 = vrot.slane %v4975_v34, 1  ;;  %v1447_v27 = vsel %vm5464_vm14, %v1357_v51, 0.0  ;;  %v703_v1 = vand.u32 15, %v597_v36  ;;  %v1312_v7 = vrot.slane %v5015_v19, 1 }
 0x122   : > { %4418 = vmatpush3.bf16.msra.mxu1 %v2409_v49  ;;  %4355 = vmatprep.mubr.msk.bf16.mxu1 %vm1530_vm4, %v5453_v48  ;;  %v717_v14 = vand.u32 15, %v599_v12  ;;  %v1310_v58 = vrot.slane %v4985_v43, 1  ;;  %v5484_v15 = vpack.c.bf16 %v1445_v38, %v1360_v21  ;;  %v1358_v54 = vsel %vm1332_vm15, %v1306_v2, %v1307_v0 }
 0x123   : > { %4629 = vmatprep.subr.msk.bf16.mxu1 %vm1579_vm0, %v5447_v32  ;;  %v1311_v24 = vrot.slane %v4973_v33, 1  ;;  %v5489_v37 = vpack.c.bf16 %v1447_v27, %v1358_v54  ;;  %v2610_v34 = vsel %vm1579_vm0, %v4903_v45, 0  ;;  %vm5497_vm3 = vcmp.lt.s32.totalorder %v703_v1, 15 }
 0x124   : > { %v1355_v19 = vsel %vm1332_vm15, %v1309_v30, %v1310_v58  ;;  %v601_v33 = vadd.s32 120, %v4815_v57  ;;  %vm5513_vm5 = vcmp.lt.s32.totalorder %v717_v14, 15  ;;  %v603_v40 = vadd.s32 136, %v4815_v57 }
 0x125   : > { %v1353_v17 = vsel %vm1332_vm15, %v1311_v24, %v1312_v7  ;;  %v1356_v31 = vsel %vm1332_vm15, %v1308_v22, %v1309_v30  ;;  %v1449_v39 = vsel %vm5497_vm3, %v1355_v19, 0.0  ;;  %v1313_v2 = vrot.slane %v5056_v13, 1 }
 0x126   : > { %v1451_v49 = vsel %vm5513_vm5, %v1353_v17, 0.0  ;;  %v731_v0 = vand.u32 15, %v601_v33  ;;  %v1316_v25 = vrot.slane %v5085_v47, 1  ;;  %v1315_v29 = vrot.slane %v5041_v53, 1 }
 0x127   : > { %4386 = vmatmul.mubr.msk.bf16.vlgmr.msra.gmra.mxu0 %vm1530_vm4, %v4929_v62  ;;  %v745_v46 = vand.u32 15, %v603_v40  ;;  %v1314_v36 = vrot.slane %v5059_v52, 1  ;;  %v5532_v22 = vpack.c.bf16 %v1449_v39, %v1356_v31  ;;  %v1354_v63 = vsel %vm1332_vm15, %v1310_v58, %v1311_v24  ;;  %v6704_v31 = vld [vmem:[#allocation14_spill] sm:$0xff] }
 0x128   : > { %4389 = vmatprep.mubr.msk.bf16.mxu0 %vm1530_vm4, %v4991_v50  ;;  %4452 = vmatpush3.bf16.msra.mxu0 %v2610_v34  ;;  %v5536_v51 = vpack.c.bf16 %v1451_v49, %v1354_v63  ;;  %v605_v13 = vadd.s32 152, %v4815_v57  ;;  %vm5543_vm6 = vcmp.lt.s32.totalorder %v731_v0, 15  ;;  %v1349_v53 = vsel %vm1332_vm15, %v1315_v29, %v1316_v25 }
 0x129   : > { %4356 = vmatmul.mubr.msk.bf16.gmra.mxu1 %vm1530_vm4, %v5484_v15  ;;  %4630 = vmatprep.subr.msk.bf16.mxu0 %vm1579_vm0, %v5507_v3  ;;  %v1351_v52 = vsel %vm1332_vm15, %v1313_v2, %v1314_v36  ;;  %vm1281_vm7 = vcmp.lt.s32.totalorder %v745_v46, 15  ;;  %v607_v12 = vadd.s32 168, %v4815_v57  ;;  %v1352_v21 = vsel %vm1332_vm15, %v1312_v7, %v1313_v2  ;;  %v6705_v46 = vld [vmem:[#allocation20_spill] sm:$0xff] }
 0x12a   : > { %4359 = vmatprep.mubr.msk.bf16.mxu1 %vm1530_vm4, %v5489_v37  ;;  %v1453_v38 = vsel %vm5543_vm6, %v1351_v52, 0.0  ;;  %v759_v30 = vand.u32 15, %v605_v13  ;;  %v1318_v27 = vrot.slane %v5111_v20, 1  ;;  %v1317_v1 = vrot.slane %v5118_v11, 1  ;;  %v6703_v11 = vld [vmem:[#allocation10_spill] sm:$0xff]  ;;  %v6706_v52 = vld [vmem:[#allocation13_spill] sm:$0xff] }
 0x12b   : > { %v1350_v14 = vsel %vm1332_vm15, %v1314_v36, %v1315_v29  ;;  %v1455_v58 = vsel %vm1281_vm7, %v1349_v53, 0.0  ;;  %v1319_v54 = vrot.slane %v5116_v55, 1  ;;  %v1320_v24 = vrot.slane %v5157_v9, 1  ;;  %v6709_v53 = vld [vmem:[#allocation18_spill] sm:$0xff] }
 0x12c   : > { %v773_v34 = vand.u32 15, %v607_v12  ;;  %v5566_v43 = vpack.c.bf16 %v1453_v38, %v1352_v21  ;;  %v5568_v7 = vpack.c.bf16 %v1455_v58, %v1350_v14  ;;  %v609_v19 = vadd.s32 184, %v4815_v57 }
 0x12d   : > { %vm5575_vm8 = vcmp.lt.s32.totalorder %v759_v30, 15  ;;  %v1347_v55 = vsel %vm1332_vm15, %v1317_v1, %v1318_v27  ;;  %v1345_v9 = vsel %vm1332_vm15, %v1319_v54, %v1320_v24  ;;  %v611_v33 = vadd.s32 200, %v4815_v57 }
 0x12e   : > { %vm1285_vm9 = vcmp.lt.s32.totalorder %v773_v34, 15  ;;  %v1348_v45 = vsel %vm1332_vm15, %v1316_v25, %v1317_v1  ;;  %v1457_v17 = vsel %vm5575_vm8, %v1347_v55, 0.0  ;;  %v787_v40 = vand.u32 15, %v609_v19  ;;  %v6710_v34 = vld [vmem:[#allocation22_spill] sm:$0xff] }
 0x12f   : > { %4390 = vmatmul.mubr.msk.bf16.gmra.mxu0 %vm1530_vm4, %v5005_v8  ;;  %v1322_v39 = vrot.slane %v6704_v31, 1  ;;  %v1321_v2 = vrot.slane %v5185_v41, 1  ;;  %v1346_v49 = vsel %vm1332_vm15, %v1318_v27, %v1319_v54  ;;  %v1459_v0 = vsel %vm1285_vm9, %v1345_v9, 0.0  ;;  %v6715_v41 = vld [vmem:[#allocation3_spill] sm:$0xff] }
 0x130   : > { %4393 = vmatprep.mubr.msk.bf16.mxu0 %vm1530_vm4, %v5073_v6  ;;  %v1323_v29 = vrot.slane %v5183_v61, 1  ;;  %v1324_v36 = vrot.slane %v6705_v46, 1  ;;  %v801_v63 = vand.u32 15, %v611_v33  ;;  %v5598_v13 = vpack.c.bf16 %v1457_v17, %v1348_v45  ;;  %v6711_v33 = vld [vmem:[#allocation19_spill] sm:$0xff]  ;;  %v6712_v45 = vld [vmem:[#allocation24_spill] sm:$0xff]  ;;  %v6713_v46 = vld [vmem:[#allocation26_spill] sm:$0xff] }
 0x131   : > { %4360 = vmatmul.mubr.msk.bf16.gmra.mxu1 %vm1530_vm4, %v5532_v22  ;;  %v5600_v25 = vpack.c.bf16 %v1459_v0, %v1346_v49  ;;  %v613_v47 = vadd.s32 216, %v4815_v57  ;;  %vm5607_vm10 = vcmp.lt.s32.totalorder %v787_v40, 15  ;;  %v1343_v61 = vsel %vm1332_vm15, %v1321_v2, %v1322_v39 }
 0x132   : > { %4363 = vmatprep.mubr.msk.bf16.mxu1 %vm1530_vm4, %v5536_v51  ;;  %vm1289_vm11 = vcmp.lt.s32.totalorder %v801_v63, 15  ;;  %v1341_v12 = vsel %vm1332_vm15, %v1323_v29, %v1324_v36  ;;  %v615_v21 = vadd.s32 232, %v4815_v57  ;;  %v1344_v38 = vsel %vm1332_vm15, %v1320_v24, %v1321_v2 }
 0x133   : > { %v1461_v30 = vsel %vm5607_vm10, %v1343_v61, 0.0  ;;  %v815_v27 = vand.u32 15, %v613_v47  ;;  %v1326_v1 = vrot.slane %v5254_v5, 1  ;;  %v1325_v14 = vrot.slane %v5275_v28, 1  ;;  %v6716_v61 = vld [vmem:[#allocation4_spill] sm:$0xff] }
 0x134   : > { %v1342_v58 = vsel %vm1332_vm15, %v1322_v39, %v1323_v29  ;;  %v1463_v54 = vsel %vm1289_vm11, %v1341_v12, 0.0  ;;  %v1327_v19 = vrot.slane %v6710_v34, 1  ;;  %v1328_v20 = vrot.slane %v5321_v26, 1  ;;  %v6717_v12 = vld [vmem:[#allocation5_spill] sm:$0xff]  ;;  %v6728_v34 = vld [vmem:[#allocation15_spill] sm:$0xff] }
 0x135   : > { %v829_v55 = vand.u32 15, %v615_v21  ;;  %v5630_v9 = vpack.c.bf16 %v1461_v30, %v1344_v38  ;;  %v5632_v24 = vpack.c.bf16 %v1463_v54, %v1342_v58  ;;  %vm1291_vm12 = vcmp.lt.s32.totalorder %v815_v27, 15  ;;  %v6718_v21 = vld [vmem:[#allocation6_spill] sm:$0xff]  ;;  %v6721_v38 = vld [vmem:[#allocation9_spill] sm:$0xff]  ;;  %v6722_v30 = vld [vmem:[#allocation11_spill] sm:$0xff] }
 0x136   : > { %v1339_v5 = vsel %vm1332_vm15, %v1325_v14, %v1326_v1  ;;  %v617_v28 = vadd.s32 248, %v4815_v57  ;;  %v1337_v26 = vsel %vm1332_vm15, %v1327_v19, %v1328_v20  ;;  %v1340_v17 = vsel %vm1332_vm15, %v1324_v36, %v1325_v14  ;;  %v4022_v57 = vld [vmem:[%s6567_s3 + $0x10] sm:$0x3]  ;;  %v6726_v58 = vld [vmem:[#allocation23_spill] sm:$0xff]  ;;  %v6727_v54 = vld [vmem:[#allocation25_spill] sm:$0xff] }
 0x137   : > { %4394 = vmatmul.mubr.msk.bf16.gmra.mxu0 %vm1530_vm4, %v5102_v60  ;;  %vm1293_vm13 = vcmp.lt.s32.totalorder %v829_v55, 15  ;;  %v1465_v40 = vsel %vm1291_vm12, %v1339_v5, 0.0  ;;  %v1329_v31 = vrot.slane %v5340_v44, 1  ;;  %v1338_v39 = vsel %vm1332_vm15, %v1326_v1, %v1327_v19  ;;  %v6723_v27 = vld [vmem:[#allocation12_spill] sm:$0xff]  ;;  %v6724_v1 = vld [vmem:[#allocation17_spill] sm:$0xff] }
 0x138   : > { %4397 = vmatprep.mubr.msk.bf16.mxu0 %vm1530_vm4, %v6703_v11  ;;  %v1467_v2 = vsel %vm1293_vm13, %v1337_v26, 0.0  ;;  %v843_v49 = vand.u32 15, %v617_v28  ;;  %v5652_v0 = vpack.c.bf16 %v1465_v40, %v1340_v17  ;;  %v6725_v14 = vld [vmem:[#allocation16_spill] sm:$0xff]  ;;  %v3210_v19 = vsel %vm1579_vm0, %v4022_v57, 0 }
 0x139   : > { %4364 = vmatmul.mubr.msk.bf16.gmra.mxu1 %vm1530_vm4, %v5566_v43  ;;  %v5654_v29 = vpack.c.bf16 %v1467_v2, %v1338_v39  ;;  %v1335_v44 = vsel %vm1332_vm15, %v1329_v31, %v1330_v59  ;;  %v1336_v36 = vsel %vm1332_vm15, %v1328_v20, %v1329_v31  ;;  %v2811_v59 = vsel %vm1579_vm0, %v5447_v32, 0 }
 0x13a   : > { %4367 = vmatprep.mubr.msk.bf16.mxu1 %vm1530_vm4, %v5568_v7  ;;  %vm1295_vm2 = vcmp.lt.s32.totalorder %v843_v49, 15  ;;  %v3009_v32 = vsel %vm1579_vm0, %v5507_v3, 0  ;;  %v6720_v3 = vld [vmem:[#allocation8_spill] sm:$0xff] }
 0x13b   : > { %v1469_v63 = vsel %vm1295_vm2, %v1335_v44, 0.0 }
 0x13c   : > { %v5670_v47 = vpack.c.bf16 %v1469_v63, %v1336_v36 }
 0x13f   : > { %4398 = vmatmul.mubr.msk.bf16.gmra.mxu0 %vm1530_vm4, %v6706_v52 }
 0x140   : > { %4401 = vmatprep.mubr.msk.bf16.mxu0 %vm1530_vm4, %v6709_v53 }
 0x141   : > { %4368 = vmatmul.mubr.msk.bf16.gmra.mxu1 %vm1530_vm4, %v5598_v13 }
 0x142   : > { %4371 = vmatprep.mubr.msk.bf16.mxu1 %vm1530_vm4, %v5600_v25 }
 0x147   : > { %4402 = vmatmul.mubr.msk.bf16.gmra.mxu0 %vm1530_vm4, %v6711_v33 }
 0x148   : > { %4405 = vmatprep.mubr.msk.bf16.mxu0 %vm1530_vm4, %v6712_v45 }
 0x149   : > { %4372 = vmatmul.mubr.msk.bf16.gmra.mxu1 %vm1530_vm4, %v5630_v9 }
 0x14a   : > { %4375 = vmatprep.mubr.msk.bf16.mxu1 %vm1530_vm4, %v5632_v24 }
 0x14f   : > { %4406 = vmatmul.mubr.msk.bf16.gmra.mxu0 %vm1530_vm4, %v6713_v46 }
 0x150   : > { %4409 = vmatprep.mubr.msk.bf16.mxu0 %vm1530_vm4, %v5370_v16 }
 0x151   : > { %4376 = vmatmul.mubr.msk.bf16.gmra.mxu1 %vm1530_vm4, %v5652_v0 }
 0x152   : > { %4379 = vmatprep.mubr.msk.bf16.mxu1 %vm1530_vm4, %v5654_v29 }
 0x157   : > { %4410 = vmatmul.mubr.msk.bf16.gmra.mxu0 %vm1530_vm4, %v5373_v35 }
 0x158   : > { %4413 = vmatprep.mubr.msk.bf16.mxu0 %vm1530_vm4, %v5437_v23 }
 0x159   : > { %4380 = vmatmul.mubr.msk.bf16.gmra.mxu1 %vm1530_vm4, %v5670_v47 }
 0x15a   : > { %4419 = vmatprep.mubr.msk.bf16.mxu1 %vm1530_vm4, %v6714_v56 }
 0x15f   : > { %4414 = vmatmul.mubr.msk.bf16.gmra.mxu0 %vm1530_vm4, %v5427_v10 }
 0x160   : > { %4453 = vmatprep.mubr.msk.bf16.mxu0 %vm1530_vm4, %v5434_v42  ;;  %v6719_v42 = vld [vmem:[#allocation7_spill] sm:$0xff] }
 0x161   : > { %4420 = vmatmul.mubr.msk.bf16.vlgmr.msra.gmra.mxu1 %vm1530_vm4, %v6715_v41 }
 0x162   : > { %4486 = vmatpush3.bf16.msra.mxu1 %v2811_v59  ;;  %4423 = vmatprep.mubr.msk.bf16.mxu1 %vm1530_vm4, %v6716_v61 }
 0x163   : > { %4631 = vmatprep.subr.msk.bf16.mxu1 %vm1579_vm0, %v4022_v57 }
 0x167   : > { %4454 = vmatmul.mubr.msk.bf16.vlgmr.msra.gmra.mxu0 %vm1530_vm4, %v5453_v48 }
 0x168   : > { %4457 = vmatprep.mubr.msk.bf16.mxu0 %vm1530_vm4, %v5484_v15  ;;  %4520 = vmatpush3.bf16.msra.mxu0 %v3009_v32 }
 0x169   : > { %4424 = vmatmul.mubr.msk.bf16.gmra.mxu1 %vm1530_vm4, %v6717_v12 }
 0x16a   : > { %4427 = vmatprep.mubr.msk.bf16.mxu1 %vm1530_vm4, %v6718_v21 }
 0x16f   : > { %4458 = vmatmul.mubr.msk.bf16.gmra.mxu0 %vm1530_vm4, %v5489_v37 }
 0x170   : > { %4461 = vmatprep.mubr.msk.bf16.mxu0 %vm1530_vm4, %v5532_v22 }
 0x171   : > { %4428 = vmatmul.mubr.msk.bf16.gmra.mxu1 %vm1530_vm4, %v6719_v42 }
 0x172   : > { %4431 = vmatprep.mubr.msk.bf16.mxu1 %vm1530_vm4, %v6720_v3 }
 0x177   : > { %4462 = vmatmul.mubr.msk.bf16.gmra.mxu0 %vm1530_vm4, %v5536_v51 }
 0x178   : > { %4465 = vmatprep.mubr.msk.bf16.mxu0 %vm1530_vm4, %v5566_v43 }
 0x179   : > { %4432 = vmatmul.mubr.msk.bf16.gmra.mxu1 %vm1530_vm4, %v6721_v38 }
 0x17a   : > { %4435 = vmatprep.mubr.msk.bf16.mxu1 %vm1530_vm4, %v6722_v30 }
 0x17f   : > { %4466 = vmatmul.mubr.msk.bf16.gmra.mxu0 %vm1530_vm4, %v5568_v7 }
 0x180   : > { %4469 = vmatprep.mubr.msk.bf16.mxu0 %vm1530_vm4, %v5598_v13 }
 0x181   : > { %4436 = vmatmul.mubr.msk.bf16.gmra.mxu1 %vm1530_vm4, %v6723_v27 }
 0x182   : > { %4439 = vmatprep.mubr.msk.bf16.mxu1 %vm1530_vm4, %v6724_v1 }
 0x187   : > { %4470 = vmatmul.mubr.msk.bf16.gmra.mxu0 %vm1530_vm4, %v5600_v25 }
 0x188   : > { %4473 = vmatprep.mubr.msk.bf16.mxu0 %vm1530_vm4, %v5630_v9 }
 0x189   : > { %4440 = vmatmul.mubr.msk.bf16.gmra.mxu1 %vm1530_vm4, %v6725_v14 }
 0x18a   : > { %4443 = vmatprep.mubr.msk.bf16.mxu1 %vm1530_vm4, %v6726_v58 }
 0x18f   : > { %4474 = vmatmul.mubr.msk.bf16.gmra.mxu0 %vm1530_vm4, %v5632_v24 }
 0x190   : > { %4477 = vmatprep.mubr.msk.bf16.mxu0 %vm1530_vm4, %v5652_v0 }
 0x191   : > { %4444 = vmatmul.mubr.msk.bf16.gmra.mxu1 %vm1530_vm4, %v6727_v54 }
 0x192   : > { %4447 = vmatprep.mubr.msk.bf16.mxu1 %vm1530_vm4, %v5368_v4 }
 0x197   : > { %4478 = vmatmul.mubr.msk.bf16.gmra.mxu0 %vm1530_vm4, %v5654_v29 }
 0x198   : > { %4481 = vmatprep.mubr.msk.bf16.mxu0 %vm1530_vm4, %v5670_v47 }
 0x199   : > { %4448 = vmatmul.mubr.msk.bf16.gmra.mxu1 %vm1530_vm4, %v6728_v34 }
 0x19a   : > { %4487 = vmatprep.mubr.msk.bf16.mxu1 %vm1530_vm4, %v4929_v62 }
 0x19f   : > { %4482 = vmatmul.mubr.msk.bf16.gmra.mxu0 %vm1530_vm4, %v5429_v18 }
 0x1a0   : > { %4521 = vmatprep.mubr.msk.bf16.mxu0 %vm1530_vm4, %v6715_v41 }
 0x1a1   : > { %v4285_v20 = vpop.f32.mrf.mxu1  ;;  %4488 = vmatmul.mubr.msk.bf16.vlgmr.msra.gmra.mxu1 %vm1530_vm4, %v4991_v50 }
 0x1a2   : > { %4554 = vmatpush3.bf16.msra.mxu1 %v3210_v19  ;;  %4491 = vmatprep.mubr.msk.bf16.mxu1 %vm1530_vm4, %v5005_v8 }
 0x1a3   : > { %v1617_v55 = vpop.f32.mrf.mxu1 }
 0x1a4   : > { %v4319_v5 = vpop.f32.mrf.mxu0 }
 0x1a5   : > { %v5761_v28 = vadd.f32 %v4319_v5, %v4285_v20  ;;  %v4286_v62 = vpop.f32.mrf.mxu1 }
 0x1a6   : > { %v1829_v26 = vpop.f32.mrf.mxu0 }
 0x1a7   : > { %v5763_v17 = vadd.f32 %v1829_v26, %v1617_v55  ;;  %v1620_v40 = vpop.f32.mrf.mxu1  ;;  %4522 = vmatmul.mubr.msk.bf16.vlgmr.msra.gmra.mxu0 %vm1530_vm4, %v6716_v61 }
 0x1a8   : > { %v4320_v31 = vpop.f32.mrf.mxu0  ;;  %4525 = vmatprep.mubr.msk.bf16.mxu0 %vm1530_vm4, %v6717_v12 }
 0x1a9   : > { %v5765_v39 = vadd.f32 %v4320_v31, %v4286_v62  ;;  %v4289_v50 = vpop.f32.mrf.mxu1  ;;  %4492 = vmatmul.mubr.msk.bf16.gmra.mxu1 %vm1530_vm4, %v5073_v6 }
 0x1aa   : > { %v1832_v2 = vpop.f32.mrf.mxu0  ;;  %4495 = vmatprep.mubr.msk.bf16.mxu1 %vm1530_vm4, %v5102_v60 }
 0x1ab   : > { %v5773_v8 = vadd.f32 %v1832_v2, %v1620_v40  ;;  %v1633_v49 = vpop.f32.mrf.mxu1 }
 0x1ac   : > { %v4323_v63 = vpop.f32.mrf.mxu0 }
 0x1ad   : > { %v4290_v44 = vpop.f32.mrf.mxu1  ;;  %v5777_v56 = vadd.f32 %v4323_v63, %v4289_v50 }
 0x1ae   : > { %v1845_v6 = vpop.f32.mrf.mxu0 }
 0x1af   : > { %v1636_v36 = vpop.f32.mrf.mxu1  ;;  %4526 = vmatmul.mubr.msk.bf16.gmra.mxu0 %vm1530_vm4, %v6718_v21  ;;  %v5785_v57 = vadd.f32 %v1845_v6, %v1633_v49 }
 0x1b0   : > { %4529 = vmatprep.mubr.msk.bf16.mxu0 %vm1530_vm4, %v6719_v42  ;;  %v4324_v41 = vpop.f32.mrf.mxu0 }
 0x1b1   : > { %v4293_v59 = vpop.f32.mrf.mxu1  ;;  %4496 = vmatmul.mubr.msk.bf16.gmra.mxu1 %vm1530_vm4, %v6703_v11  ;;  %v5789_v61 = vadd.f32 %v4324_v41, %v4290_v44 }
 0x1b2   : > { %4499 = vmatprep.mubr.msk.bf16.mxu1 %vm1530_vm4, %v6706_v52  ;;  %v1848_v12 = vpop.f32.mrf.mxu0 }
 0x1b3   : > { %v1649_v60 = vpop.f32.mrf.mxu1  ;;  %v5791_v19 = vadd.f32 %v1848_v12, %v1636_v36 }
 0x1b5   : > { %v4294_v32 = vpop.f32.mrf.mxu1 }
 0x1b6   : > { %v4327_v20 = vpop.f32.mrf.mxu0 }
 0x1b7   : > { %v1652_v21 = vpop.f32.mrf.mxu1  ;;  %4530 = vmatmul.mubr.msk.bf16.gmra.mxu0 %vm1530_vm4, %v6720_v3  ;;  %v5797_v42 = vadd.f32 %v4327_v20, %v4293_v59 }
 0x1b8   : > { %4533 = vmatprep.mubr.msk.bf16.mxu0 %vm1530_vm4, %v6721_v38  ;;  %v1861_v52 = vpop.f32.mrf.mxu0 }
 0x1b9   : > { %v4297_v11 = vpop.f32.mrf.mxu1  ;;  %4500 = vmatmul.mubr.msk.bf16.gmra.mxu1 %vm1530_vm4, %v6709_v53  ;;  %v5803_v5 = vadd.f32 %v1861_v52, %v1649_v60 }
 0x1ba   : > { %4503 = vmatprep.mubr.msk.bf16.mxu1 %vm1530_vm4, %v6711_v33  ;;  %v4328_v62 = vpop.f32.mrf.mxu0 }
 0x1bb   : > { %v1665_v55 = vpop.f32.mrf.mxu1  ;;  %v5805_v40 = vadd.f32 %v4328_v62, %v4294_v32 }
 0x1bc   : > { %v1864_v3 = vpop.f32.mrf.mxu0 }
 0x1bd   : > { %v4298_v26 = vpop.f32.mrf.mxu1  ;;  %v5807_v50 = vadd.f32 %v1864_v3, %v1652_v21 }
 0x1be   : > { %v4331_v53 = vpop.f32.mrf.mxu0 }
 0x1bf   : > { %v1668_v31 = vpop.f32.mrf.mxu1  ;;  %4534 = vmatmul.mubr.msk.bf16.gmra.mxu0 %vm1530_vm4, %v6722_v30  ;;  %v5813_v33 = vadd.f32 %v4331_v53, %v4297_v11 }
 0x1c0   : > { %4537 = vmatprep.mubr.msk.bf16.mxu0 %vm1530_vm4, %v6723_v27  ;;  %v1877_v2 = vpop.f32.mrf.mxu0 }
 0x1c1   : > { %v4301_v38 = vpop.f32.mrf.mxu1  ;;  %4504 = vmatmul.mubr.msk.bf16.gmra.mxu1 %vm1530_vm4, %v6712_v45  ;;  %v5819_v44 = vadd.f32 %v1877_v2, %v1665_v55  ;;  %v6729_v2 = vld [vmem:[#allocation21_spill] sm:$0xff] }
 0x1c2   : > { %4507 = vmatprep.mubr.msk.bf16.mxu1 %vm1530_vm4, %v6713_v46  ;;  %v4332_v36 = vpop.f32.mrf.mxu0 }
 0x1c3   : > { %v1681_v49 = vpop.f32.mrf.mxu1  ;;  %v5821_v59 = vadd.f32 %v4332_v36, %v4298_v26 }
 0x1c4   : > { %v1880_v30 = vpop.f32.mrf.mxu0 }
 0x1c5   : > { %v4302_v63 = vpop.f32.mrf.mxu1  ;;  %v5825_v45 = vadd.f32 %v1880_v30, %v1668_v31 }
 0x1c6   : > { %v4335_v60 = vpop.f32.mrf.mxu0 }
 0x1c7   : > { %v5823_v6 = vpop.f32.mrf.mxu1  ;;  %4538 = vmatmul.mubr.msk.bf16.gmra.mxu0 %vm1530_vm4, %v6724_v1  ;;  %v5831_v46 = vadd.f32 %v4335_v60, %v4301_v38 }
 0x1c8   : > { %4541 = vmatprep.mubr.msk.bf16.mxu0 %vm1530_vm4, %v6725_v14  ;;  %v1893_v41 = vpop.f32.mrf.mxu0 }
 0x1c9   : > { %v4305_v27 = vpop.f32.mrf.mxu1  ;;  %4508 = vmatmul.mubr.msk.bf16.gmra.mxu1 %vm1530_vm4, %v5370_v16  ;;  %v5837_v12 = vadd.f32 %v1893_v41, %v1681_v49 }
 0x1ca   : > { %4511 = vmatprep.mubr.msk.bf16.mxu1 %vm1530_vm4, %v5373_v35  ;;  %v4336_v21 = vpop.f32.mrf.mxu0 }
 0x1cb   : > { %v1697_v32 = vpop.f32.mrf.mxu1  ;;  %v5839_v11 = vadd.f32 %v4336_v21, %v4302_v63  ;;  %v6730_v21 = vmov 0.0|0.0  }
 0x1cc   : > { %v5841_v1 = vpop.f32.mrf.mxu0 }
 0x1cd   : > { %v4306_v20 = vpop.f32.mrf.mxu1 }
 0x1cf   : > { %v5843_v52 = vpop.f32.mrf.mxu1  ;;  %v4339_v16 = vpop.f32.mrf.mxu0  ;;  %4542 = vmatmul.mubr.msk.bf16.gmra.mxu0 %vm1530_vm4, %v6726_v58 }
 0x1d0   : > { %v5849_v35 = vadd.f32 %v4339_v16, %v4305_v27  ;;  %4545 = vmatprep.mubr.msk.bf16.mxu0 %vm1530_vm4, %v6727_v54 }
 0x1d1   : > { %v4309_v14 = vpop.f32.mrf.mxu1  ;;  %4512 = vmatmul.mubr.msk.bf16.gmra.mxu1 %vm1530_vm4, %v5437_v23  ;;  %v1909_v55 = vpop.f32.mrf.mxu0 }
 0x1d2   : > { %4515 = vmatprep.mubr.msk.bf16.mxu1 %vm1530_vm4, %v5427_v10  ;;  %v5855_v26 = vadd.f32 %v1909_v55, %v1697_v32 }
 0x1d3   : > { %v1713_v62 = vpop.f32.mrf.mxu1  ;;  %v4340_v3 = vpop.f32.mrf.mxu0 }
 0x1d4   : > { %v5857_v53 = vadd.f32 %v4340_v3, %v4306_v20 }
 0x1d5   : > { %v4310_v31 = vpop.f32.mrf.mxu1  ;;  %v5859_v58 = vpop.f32.mrf.mxu0 }
 0x1d7   : > { %v5861_v38 = vpop.f32.mrf.mxu1  ;;  %v4343_v23 = vpop.f32.mrf.mxu0  ;;  %4546 = vmatmul.mubr.msk.bf16.gmra.mxu0 %vm1530_vm4, %v5368_v4 }
 0x1d8   : > { %v5867_v10 = vadd.f32 %v4343_v23, %v4309_v14  ;;  %4549 = vmatprep.mubr.msk.bf16.mxu0 %vm1530_vm4, %v6728_v34 }
 0x1d9   : > { %v4313_v54 = vpop.f32.mrf.mxu1  ;;  %4516 = vmatmul.mubr.msk.bf16.gmra.mxu1 %vm1530_vm4, %v6729_v2  ;;  %v1925_v49 = vpop.f32.mrf.mxu0 }
 0x1da   : > { %4555 = vmatprep.mubr.msk.bf16.mxu1 %vm1530_vm4, %v5453_v48  ;;  %v5873_v63 = vadd.f32 %v1925_v49, %v1713_v62 }
 0x1db   : > { %v1729_v36 = vpop.f32.mrf.mxu1  ;;  %v4344_v30 = vpop.f32.mrf.mxu0 }
 0x1dc   : > { %v5875_v27 = vadd.f32 %v4344_v30, %v4310_v31 }
 0x1dd   : > { %v4314_v60 = vpop.f32.mrf.mxu1  ;;  %v5877_v4 = vpop.f32.mrf.mxu0 }
 0x1df   : > { %v5879_v41 = vpop.f32.mrf.mxu1  ;;  %v4347_v32 = vpop.f32.mrf.mxu0  ;;  %4550 = vmatmul.mubr.bf16.gmra.mxu0 %v6730_v21 }
 0x1e0   : > { %v5884_v48 = vadd.f32 %v4347_v32, %v4313_v54 }
 0x1e1   : > { %v4353_v20 = vpop.f32.mrf.mxu1  ;;  %4556 = vmatmul.mubr.msk.bf16.vlgmr.msra.gmra.mxu1 %vm1530_vm4, %v5484_v15  ;;  %v1941_v16 = vpop.f32.mrf.mxu0 }
 0x1e2   : > { %v2172_v34 = vadd.f32 %v4353_v20, %v5761_v28  ;;  %4559 = vmatprep.mubr.msk.bf16.mxu1 %vm1530_vm4, %v5489_v37  ;;  %v5889_v55 = vadd.f32 %v1941_v16, %v1729_v36 }
 0x1e3   : > { %v2043_v14 = vpop.f32.mrf.mxu1  ;;  %v4348_v3 = vpop.f32.mrf.mxu0 }
 0x1e4   : > { %v2170_v62 = vadd.f32 %v2043_v14, %v5763_v17  ;;  %v5892_v23 = vadd.f32 %v4348_v3, %v4314_v60 }
 0x1e5   : > { %v4354_v31 = vpop.f32.mrf.mxu1  ;;  %v5895_v15 = vpop.f32.mrf.mxu0 }
 0x1e6   : > { %v2173_v2 = vadd.f32 %v4354_v31, %v5765_v39 }
 0x1e7   : > { %v2046_v54 = vpop.f32.mrf.mxu1  ;;  %v4387_v49 = vpop.f32.mrf.mxu0 }
 0x1e8   : > { %v5898_v28 = vadd.f32 %v2046_v54, %v5773_v8  ;;  %v5902_v36 = vadd.f32 %v4387_v49, %v2172_v34 }
 0x1e9   : > { %v4357_v37 = vpop.f32.mrf.mxu1  ;;  %4560 = vmatmul.mubr.msk.bf16.gmra.mxu1 %vm1530_vm4, %v5532_v22  ;;  %v2244_v30 = vpop.f32.mrf.mxu0 }
 0x1ea   : > { %v2176_v17 = vadd.f32 %v4357_v37, %v5777_v56  ;;  %4563 = vmatprep.mubr.msk.bf16.mxu1 %vm1530_vm4, %v5536_v51  ;;  %v5907_v60 = vadd.f32 %v2244_v30, %v2170_v62 }
 0x1eb   : > { %v2059_v39 = vpop.f32.mrf.mxu1  ;;  %v4388_v8 = vpop.f32.mrf.mxu0 }
 0x1ec   : > { %v2174_v32 = vadd.f32 %v2059_v39, %v5785_v57  ;;  %v5910_v16 = vadd.f32 %v4388_v8, %v2173_v2 }
 0x1ed   : > { %v4358_v20 = vpop.f32.mrf.mxu1  ;;  %v5913_v22 = vpop.f32.mrf.mxu0 }
 0x1ee   : > { %v2177_v14 = vadd.f32 %v4358_v20, %v5789_v61 }
 0x1ef   : > { %v2062_v34 = vpop.f32.mrf.mxu1  ;;  %v4391_v3 = vpop.f32.mrf.mxu0 }
 0x1f0   : > { %v5916_v56 = vadd.f32 %v2062_v34, %v5791_v19  ;;  %v5920_v62 = vadd.f32 %v4391_v3, %v2176_v17 }
 0x1f1   : > { %v4361_v51 = vpop.f32.mrf.mxu1  ;;  %4564 = vmatmul.mubr.msk.bf16.gmra.mxu1 %vm1530_vm4, %v5566_v43  ;;  %v2260_v31 = vpop.f32.mrf.mxu0  ;;  %v3492_v43 = vld [vmem:[%s6569_s5] sm:$0x3] }
 0x1f2   : > { %v2180_v57 = vadd.f32 %v4361_v51, %v5797_v42  ;;  %4567 = vmatprep.mubr.msk.bf16.mxu1 %vm1530_vm4, %v5568_v7  ;;  %v5925_v2 = vadd.f32 %v2260_v31, %v2174_v32  ;;  %4632 = vmatprep.subr.msk.bf16.mxu0 %vm1579_vm0, %v3492_v43  ;;  %v3549_v7 = vsel %vm1579_vm0, %v3492_v43, 0 }
 0x1f3   : > { %v2075_v61 = vpop.f32.mrf.mxu1  ;;  %v4392_v19 = vpop.f32.mrf.mxu0  ;;  %4588 = vmatpush3.bf16.msra.mxu0 %v3549_v7  ;;  %v1897_v7 = vadd.f32 %v5841_v1, %v5823_v6 }
 0x1f4   : > { %v2178_v54 = vadd.f32 %v2075_v61, %v5803_v5  ;;  %v5928_v37 = vadd.f32 %v4392_v19, %v2177_v14 }
 0x1f5   : > { %v4362_v49 = vpop.f32.mrf.mxu1  ;;  %v5934_v42 = vpop.f32.mrf.mxu0 }
 0x1f6   : > { %v2181_v30 = vadd.f32 %v4362_v49, %v5805_v40 }
 0x1f7   : > { %v2078_v17 = vpop.f32.mrf.mxu1  ;;  %v4395_v5 = vpop.f32.mrf.mxu0 }
 0x1f8   : > { %v5939_v39 = vadd.f32 %v2078_v17, %v5807_v50  ;;  %v5943_v40 = vadd.f32 %v4395_v5, %v2180_v57 }
 0x1f9   : > { %v4365_v32 = vpop.f32.mrf.mxu1  ;;  %4568 = vmatmul.mubr.msk.bf16.gmra.mxu1 %vm1530_vm4, %v5598_v13  ;;  %v2276_v20 = vpop.f32.mrf.mxu0 }
 0x1fa   : > { %v2184_v8 = vadd.f32 %v4365_v32, %v5813_v33  ;;  %4571 = vmatprep.mubr.msk.bf16.mxu1 %vm1530_vm4, %v5600_v25  ;;  %v5948_v34 = vadd.f32 %v2276_v20, %v2178_v54 }
 0x1fb   : > { %v2091_v14 = vpop.f32.mrf.mxu1  ;;  %v4396_v3 = vpop.f32.mrf.mxu0 }
 0x1fc   : > { %v2182_v50 = vadd.f32 %v2091_v14, %v5819_v44  ;;  %v5951_v31 = vadd.f32 %v4396_v3, %v2181_v30 }
 0x1fd   : > { %v4366_v51 = vpop.f32.mrf.mxu1  ;;  %v5954_v13 = vpop.f32.mrf.mxu0 }
 0x1fe   : > { %v2185_v61 = vadd.f32 %v4366_v51, %v5821_v59 }
 0x1ff   : > { %v2094_v57 = vpop.f32.mrf.mxu1  ;;  %v4399_v19 = vpop.f32.mrf.mxu0 }
 0x200   : > { %v5957_v33 = vadd.f32 %v2094_v57, %v5825_v45  ;;  %v5961_v54 = vadd.f32 %v4399_v19, %v2184_v8 }
 0x201   : > { %v4369_v25 = vpop.f32.mrf.mxu1  ;;  %4572 = vmatmul.mubr.msk.bf16.gmra.mxu1 %vm1530_vm4, %v5630_v9  ;;  %v2292_v49 = vpop.f32.mrf.mxu0 }
 0x202   : > { %v2188_v44 = vadd.f32 %v4369_v25, %v5831_v46  ;;  %4575 = vmatprep.mubr.msk.bf16.mxu1 %vm1530_vm4, %v5632_v24  ;;  %v5966_v30 = vadd.f32 %v2292_v49, %v2182_v50 }
 0x203   : > { %v2107_v59 = vpop.f32.mrf.mxu1  ;;  %v4400_v45 = vpop.f32.mrf.mxu0 }
 0x204   : > { %v2186_v43 = vadd.f32 %v2107_v59, %v5837_v12  ;;  %v5971_v5 = vadd.f32 %v4400_v45, %v2185_v61  ;;  %v1913_v61 = vadd.f32 %v5859_v58, %v5843_v52 }
 0x205   : > { %v4370_v17 = vpop.f32.mrf.mxu1  ;;  %v5974_v32 = vpop.f32.mrf.mxu0 }
 0x206   : > { %v2189_v9 = vadd.f32 %v4370_v17, %v5839_v11 }
 0x207   : > { %v2110_v46 = vpop.f32.mrf.mxu1  ;;  %v4403_v24 = vpop.f32.mrf.mxu0 }
 0x208   : > { %v2187_v8 = vadd.f32 %v2110_v46, %v1897_v7  ;;  %v5978_v14 = vadd.f32 %v4403_v24, %v2188_v44  ;;  %v1929_v7 = vadd.f32 %v5877_v4, %v5861_v38 }
 0x209   : > { %v4373_v20 = vpop.f32.mrf.mxu1  ;;  %4576 = vmatmul.mubr.msk.bf16.gmra.mxu1 %vm1530_vm4, %v5652_v0  ;;  %v2308_v6 = vpop.f32.mrf.mxu0 }
 0x20a   : > { %v2192_v12 = vadd.f32 %v4373_v20, %v5849_v35  ;;  %4579 = vmatprep.mubr.msk.bf16.mxu1 %vm1530_vm4, %v5654_v29  ;;  %v5983_v50 = vadd.f32 %v2308_v6, %v2186_v43 }
 0x20b   : > { %v2123_v1 = vpop.f32.mrf.mxu1  ;;  %v4404_v3 = vpop.f32.mrf.mxu0 }
 0x20c   : > { %v2190_v11 = vadd.f32 %v2123_v1, %v5855_v26  ;;  %v5988_v57 = vadd.f32 %v4404_v3, %v2189_v9  ;;  %v1945_v3 = vadd.f32 %v5895_v15, %v5879_v41 }
 0x20d   : > { %v4374_v51 = vpop.f32.mrf.mxu1  ;;  %v2311_v19 = vpop.f32.mrf.mxu0 }
 0x20e   : > { %v2193_v0 = vadd.f32 %v4374_v51, %v5857_v53  ;;  %v5991_v25 = vadd.f32 %v2311_v19, %v2187_v8 }
 0x20f   : > { %v2126_v35 = vpop.f32.mrf.mxu1  ;;  %v4407_v44 = vpop.f32.mrf.mxu0 }
 0x210   : > { %v2191_v29 = vadd.f32 %v2126_v35, %v1913_v61  ;;  %v5995_v26 = vadd.f32 %v4407_v44, %v2192_v12 }
 0x211   : > { %v4377_v49 = vpop.f32.mrf.mxu1  ;;  %4580 = vmatmul.mubr.msk.bf16.gmra.mxu1 %vm1530_vm4, %v5670_v47  ;;  %v2324_v52 = vpop.f32.mrf.mxu0 }
 0x212   : > { %v2196_v59 = vadd.f32 %v4377_v49, %v5867_v10  ;;  %4583 = vmatprep.mubr.msk.bf16.mxu1 %vm1530_vm4, %v5429_v18  ;;  %v6000_v53 = vadd.f32 %v2324_v52, %v2190_v11 }
 0x213   : > { %v2139_v58 = vpop.f32.mrf.mxu1  ;;  %v4408_v45 = vpop.f32.mrf.mxu0 }
 0x214   : > { %v2194_v43 = vadd.f32 %v2139_v58, %v5873_v63  ;;  %v6005_v9 = vadd.f32 %v4408_v45, %v2193_v0 }
 0x215   : > { %v4378_v17 = vpop.f32.mrf.mxu1  ;;  %v2327_v46 = vpop.f32.mrf.mxu0 }
 0x216   : > { %v2197_v47 = vadd.f32 %v4378_v17, %v5875_v27  ;;  %v6008_v8 = vadd.f32 %v2327_v46, %v2191_v29 }
 0x217   : > { %v2142_v10 = vpop.f32.mrf.mxu1  ;;  %v4411_v24 = vpop.f32.mrf.mxu0 }
 0x218   : > { %v2195_v18 = vadd.f32 %v2142_v10, %v1929_v7  ;;  %v6011_v12 = vadd.f32 %v4411_v24, %v2196_v59 }
 0x219   : > { %v4381_v20 = vpop.f32.mrf.mxu1  ;;  %4584 = vmatmul.mubr.bf16.gmra.mxu1 %v6730_v21  ;;  %v2340_v6 = vpop.f32.mrf.mxu0 }
 0x21a   : > { %v2200_v63 = vadd.f32 %v4381_v20, %v5884_v48  ;;  %v6014_v38 = vadd.f32 %v2340_v6, %v2194_v43  ;;  %v2376_v6 = vadd.f32 %v5934_v42, %v5916_v56 }
 0x21b   : > { %v2155_v1 = vpop.f32.mrf.mxu1  ;;  %v4412_v27 = vpop.f32.mrf.mxu0 }
 0x21c   : > { %v2198_v4 = vadd.f32 %v2155_v1, %v5889_v55  ;;  %v6019_v51 = vadd.f32 %v4412_v27, %v2197_v47 }
 0x21d   : > { %v4382_v11 = vpop.f32.mrf.mxu1  ;;  %v2343_v21 = vpop.f32.mrf.mxu0 }
 0x21e   : > { %v2201_v61 = vadd.f32 %v4382_v11, %v5892_v23  ;;  %v6022_v19 = vadd.f32 %v2343_v21, %v2195_v18  ;;  %v2372_v23 = vadd.f32 %v5913_v22, %v5898_v28 }
 0x21f   : > { %v2158_v0 = vpop.f32.mrf.mxu1  ;;  %v4415_v35 = vpop.f32.mrf.mxu0 }
 0x220   : > { %v2199_v48 = vadd.f32 %v2158_v0, %v1945_v3  ;;  %v6024_v44 = vadd.f32 %v4415_v35, %v2200_v63  ;;  %v2380_v35 = vadd.f32 %v5954_v13, %v5939_v39 }
 0x221   : > { %v4421_v29 = vpop.f32.mrf.mxu1  ;;  %v2356_v49 = vpop.f32.mrf.mxu0 }
 0x222   : > { %v2574_v55 = vadd.f32 %v4421_v29, %v5902_v36  ;;  %v6027_v52 = vadd.f32 %v2356_v49, %v2198_v4 }
 0x223   : > { %v2445_v59 = vpop.f32.mrf.mxu1  ;;  %v4416_v15 = vpop.f32.mrf.mxu0 }
 0x224   : > { %v2572_v41 = vadd.f32 %v2445_v59, %v5907_v60  ;;  %v6032_v43 = vadd.f32 %v4416_v15, %v2201_v61 }
 0x225   : > { %v4422_v58 = vpop.f32.mrf.mxu1  ;;  %v2359_v17 = vpop.f32.mrf.mxu0 }
 0x226   : > { %v6035_v45 = vadd.f32 %v4422_v58, %v5910_v16  ;;  %v6037_v47 = vadd.f32 %v2359_v17, %v2199_v48 }
 0x227   : > { %v2448_v7 = vpop.f32.mrf.mxu1  ;;  %v4455_v46 = vpop.f32.mrf.mxu0 }
 0x228   : > { %v6039_v36 = vadd.f32 %v2448_v7, %v2372_v23  ;;  %v6041_v18 = vadd.f32 %v4455_v46, %v2574_v55  ;;  %v2384_v7 = vadd.f32 %v5974_v32, %v5957_v33 }
 0x229   : > { %v4425_v10 = vpop.f32.mrf.mxu1  ;;  %v2646_v24 = vpop.f32.mrf.mxu0 }
 0x22a   : > { %v2578_v60 = vadd.f32 %v4425_v10, %v5920_v62  ;;  %v6044_v28 = vadd.f32 %v2646_v24, %v2572_v41 }
 0x22b   : > { %v2461_v20 = vpop.f32.mrf.mxu1  ;;  %v6047_v16 = vpop.f32.mrf.mxu0 }
 0x22c   : > { %v2576_v22 = vadd.f32 %v2461_v20, %v5925_v2 }
 0x22d   : > { %v4426_v63 = vpop.f32.mrf.mxu1  ;;  %v6054_v4 = vpop.f32.mrf.mxu0 }
 0x22e   : > { %v6052_v1 = vadd.f32 %v4426_v63, %v5928_v37 }
 0x22f   : > { %v2464_v27 = vpop.f32.mrf.mxu1  ;;  %v4459_v62 = vpop.f32.mrf.mxu0 }
 0x230   : > { %v6056_v11 = vadd.f32 %v2464_v27, %v2376_v6  ;;  %v6058_v61 = vadd.f32 %v4459_v62, %v2578_v60 }
 0x231   : > { %v4429_v3 = vpop.f32.mrf.mxu1  ;;  %v2662_v21 = vpop.f32.mrf.mxu0 }
 0x232   : > { %v2582_v2 = vadd.f32 %v4429_v3, %v5943_v40  ;;  %v6061_v48 = vadd.f32 %v2662_v21, %v2576_v22 }
 0x233   : > { %v2477_v0 = vpop.f32.mrf.mxu1  ;;  %v6064_v42 = vpop.f32.mrf.mxu0 }
 0x234   : > { %v2580_v56 = vadd.f32 %v2477_v0, %v5948_v34 }
 0x235   : > { %v4430_v37 = vpop.f32.mrf.mxu1  ;;  %v6071_v55 = vpop.f32.mrf.mxu0 }
 0x236   : > { %v6069_v29 = vadd.f32 %v4430_v37, %v5951_v31 }
 0x237   : > { %v2480_v49 = vpop.f32.mrf.mxu1  ;;  %v4463_v40 = vpop.f32.mrf.mxu0 }
 0x238   : > { %v6073_v59 = vadd.f32 %v2480_v49, %v2380_v35  ;;  %v6075_v15 = vadd.f32 %v4463_v40, %v2582_v2 }
 0x239   : > { %v4433_v41 = vpop.f32.mrf.mxu1  ;;  %v2678_v58 = vpop.f32.mrf.mxu0 }
 0x23a   : > { %v2586_v34 = vadd.f32 %v4433_v41, %v5961_v54  ;;  %v6078_v17 = vadd.f32 %v2678_v58, %v2580_v56 }
 0x23b   : > { %v2493_v23 = vpop.f32.mrf.mxu1  ;;  %v6081_v13 = vpop.f32.mrf.mxu0 }
 0x23c   : > { %v2584_v39 = vadd.f32 %v2493_v23, %v5966_v30 }
 0x23d   : > { %v4434_v31 = vpop.f32.mrf.mxu1  ;;  %v6088_v10 = vpop.f32.mrf.mxu0 }
 0x23e   : > { %v6086_v46 = vadd.f32 %v4434_v31, %v5971_v5 }
 0x23f   : > { %v2496_v60 = vpop.f32.mrf.mxu1  ;;  %v4467_v54 = vpop.f32.mrf.mxu0 }
 0x240   : > { %v6090_v24 = vadd.f32 %v2496_v60, %v2384_v7  ;;  %v6092_v22 = vadd.f32 %v4467_v54, %v2586_v34 }
 0x241   : > { %v4437_v20 = vpop.f32.mrf.mxu1  ;;  %v2694_v63 = vpop.f32.mrf.mxu0 }
 0x242   : > { %v2590_v30 = vadd.f32 %v4437_v20, %v5978_v14  ;;  %v6095_v27 = vadd.f32 %v2694_v63, %v2584_v39 }
 0x243   : > { %v2509_v6 = vpop.f32.mrf.mxu1  ;;  %v6098_v32 = vpop.f32.mrf.mxu0 }
 0x244   : > { %v2588_v33 = vadd.f32 %v2509_v6, %v5983_v50 }
 0x245   : > { %v4438_v5 = vpop.f32.mrf.mxu1  ;;  %v6103_v3 = vpop.f32.mrf.mxu0 }
 0x246   : > { %v6101_v62 = vadd.f32 %v4438_v5, %v5988_v57 }
 0x247   : > { %v2512_v2 = vpop.f32.mrf.mxu1  ;;  %v4471_v0 = vpop.f32.mrf.mxu0 }
 0x248   : > { %v6106_v21 = vadd.f32 %v2512_v2, %v5991_v25  ;;  %v6108_v56 = vadd.f32 %v4471_v0, %v2590_v30 }
 0x249   : > { %v4441_v14 = vpop.f32.mrf.mxu1  ;;  %v2710_v35 = vpop.f32.mrf.mxu0 }
 0x24a   : > { %v2594_v37 = vadd.f32 %v4441_v14, %v5995_v26  ;;  %v6111_v49 = vadd.f32 %v2710_v35, %v2588_v33 }
 0x24b   : > { %v2525_v50 = vpop.f32.mrf.mxu1  ;;  %v6114_v57 = vpop.f32.mrf.mxu0 }
 0x24c   : > { %v2592_v40 = vadd.f32 %v2525_v50, %v6000_v53 }
 0x24d   : > { %v4442_v41 = vpop.f32.mrf.mxu1  ;;  %v6119_v25 = vpop.f32.mrf.mxu0 }
 0x24e   : > { %v6117_v34 = vadd.f32 %v4442_v41, %v6005_v9  ;;  %6732 = vst [vmem:[#allocation14_spill] sm:$0xff] %v6119_v25 }
 0x24f   : > { %v2528_v58 = vpop.f32.mrf.mxu1  ;;  %v4475_v39 = vpop.f32.mrf.mxu0 }
 0x250   : > { %6731 = vst [vmem:[#allocation10_spill] sm:$0xff] %v6117_v34  ;;  %v6122_v23 = vadd.f32 %v2528_v58, %v6008_v8  ;;  %v6124_v31 = vadd.f32 %v4475_v39, %v2594_v37 }
 0x251   : > { %v4445_v26 = vpop.f32.mrf.mxu1  ;;  %v2726_v60 = vpop.f32.mrf.mxu0 }
 0x252   : > { %6733 = vst [vmem:[#allocation20_spill] sm:$0xff] %v6122_v23  ;;  %v2598_v7 = vadd.f32 %v4445_v26, %v6011_v12  ;;  %v6127_v54 = vadd.f32 %v2726_v60, %v2592_v40 }
 0x253   : > { %v2541_v53 = vpop.f32.mrf.mxu1  ;;  %v6130_v9 = vpop.f32.mrf.mxu0 }
 0x254   : > { %v2596_v20 = vadd.f32 %v2541_v53, %v6014_v38  ;;  %6734 = vst [vmem:[#allocation13_spill] sm:$0xff] %v6130_v9 }
 0x255   : > { %v4446_v30 = vpop.f32.mrf.mxu1  ;;  %v6135_v8 = vpop.f32.mrf.mxu0 }
 0x256   : > { %v6133_v63 = vadd.f32 %v4446_v30, %v6019_v51  ;;  %6736 = vst [vmem:[#allocation22_spill] sm:$0xff] %v6135_v8 }
 0x257   : > { %v2544_v6 = vpop.f32.mrf.mxu1  ;;  %v4479_v5 = vpop.f32.mrf.mxu0 }
 0x258   : > { %6735 = vst [vmem:[#allocation18_spill] sm:$0xff] %v6133_v63  ;;  %v6138_v33 = vadd.f32 %v2544_v6, %v6022_v19  ;;  %v6140_v2 = vadd.f32 %v4479_v5, %v2598_v7 }
 0x259   : > { %v4449_v12 = vpop.f32.mrf.mxu1  ;;  %v2742_v14 = vpop.f32.mrf.mxu0 }
 0x25a   : > { %6737 = vst [vmem:[#allocation19_spill] sm:$0xff] %v6138_v33  ;;  %v2602_v0 = vadd.f32 %v4449_v12, %v6024_v44  ;;  %v6143_v37 = vadd.f32 %v2742_v14, %v2596_v20 }
 0x25b   : > { %v2557_v38 = vpop.f32.mrf.mxu1  ;;  %v6146_v51 = vpop.f32.mrf.mxu0 }
 0x25c   : > { %v2600_v35 = vadd.f32 %v2557_v38, %v6027_v52  ;;  %6738 = vst [vmem:[#allocation24_spill] sm:$0xff] %v6146_v51 }
 0x25d   : > { %v4450_v50 = vpop.f32.mrf.mxu1  ;;  %v6151_v19 = vpop.f32.mrf.mxu0 }
 0x25e   : > { %v6149_v40 = vadd.f32 %v4450_v50, %v6032_v43  ;;  %6740 = vst [vmem:[#allocation2_spill] sm:$0xff] %v6151_v19 }
 0x25f   : > { %v2560_v41 = vpop.f32.mrf.mxu1  ;;  %v4483_v39 = vpop.f32.mrf.mxu0 }
 0x260   : > { %6739 = vst [vmem:[#allocation26_spill] sm:$0xff] %v6149_v40  ;;  %v6154_v58 = vadd.f32 %v2560_v41, %v6037_v47  ;;  %v2803_v26 = vadd.f32 %v4483_v39, %v2602_v0 }
 0x261   : > { %v4489_v44 = vpop.f32.mrf.mxu1  ;;  %v2758_v60 = vpop.f32.mrf.mxu0 }
 0x262   : > { %6741 = vst [vmem:[#allocation3_spill] sm:$0xff] %v6154_v58  ;;  %v6157_v7 = vadd.f32 %v4489_v44, %v6041_v18  ;;  %v2801_v53 = vadd.f32 %v2758_v60, %v2600_v35 }
 0x263   : > { %v2847_v52 = vpop.f32.mrf.mxu1  ;;  %v6162_v43 = vpop.f32.mrf.mxu0 }
 0x264   : > { %v6160_v20 = vadd.f32 %v2847_v52, %v6044_v28  ;;  %6742 = vst [vmem:[#allocation4_spill] sm:$0xff] %v6162_v43 }
 0x265   : > { %v6164_v30 = vpop.f32.mrf.mxu1  ;;  %v6166_v6 = vpop.f32.mrf.mxu0 }
 0x266   : > { %6743 = vst [vmem:[#allocation5_spill] sm:$0xff] %v6166_v6 }
 0x267   : > { %v6168_v47 = vpop.f32.mrf.mxu1  ;;  %v4523_v5 = vpop.f32.mrf.mxu0 }
 0x269   : > { %v4493_v12 = vpop.f32.mrf.mxu1  ;;  %v3045_v18 = vpop.f32.mrf.mxu0 }
 0x26a   : > { %v6171_v0 = vadd.f32 %v4493_v12, %v6058_v61 }
 0x26b   : > { %v2863_v14 = vpop.f32.mrf.mxu1  ;;  %v6176_v28 = vpop.f32.mrf.mxu0 }
 0x26c   : > { %v6174_v38 = vadd.f32 %v2863_v14, %v6061_v48 }
 0x26d   : > { %v6178_v35 = vpop.f32.mrf.mxu1  ;;  %v6180_v50 = vpop.f32.mrf.mxu0 }
 0x26f   : > { %v6182_v41 = vpop.f32.mrf.mxu1  ;;  %v6184_v39 = vpop.f32.mrf.mxu0 }
 0x271   : > { %v4497_v44 = vpop.f32.mrf.mxu1  ;;  %v6189_v61 = vpop.f32.mrf.mxu0 }
 0x272   : > { %v6187_v60 = vadd.f32 %v4497_v44, %v6075_v15 }
 0x273   : > { %v2879_v52 = vpop.f32.mrf.mxu1  ;;  %v6196_v14 = vpop.f32.mrf.mxu0 }
 0x274   : > { %v6192_v48 = vadd.f32 %v2879_v52, %v6078_v17 }
 0x275   : > { %v6194_v12 = vpop.f32.mrf.mxu1  ;;  %v6203_v40 = vpop.f32.mrf.mxu0 }
 0x277   : > { %v6198_v6 = vpop.f32.mrf.mxu1  ;;  %v6210_v17 = vpop.f32.mrf.mxu0 }
 0x279   : > { %v4501_v58 = vpop.f32.mrf.mxu1  ;;  %v6217_v63 = vpop.f32.mrf.mxu0 }
 0x27a   : > { %v6201_v43 = vadd.f32 %v4501_v58, %v6092_v22 }
 0x27b   : > { %v2895_v15 = vpop.f32.mrf.mxu1 }
 0x27c   : > { %v6206_v44 = vadd.f32 %v2895_v15, %v6095_v27  ;;  %v6224_v27 = vpop.f32.mrf.mxu0 }
 0x27d   : > { %v6208_v19 = vpop.f32.mrf.mxu1 }
 0x27e   : > { %v6231_v34 = vpop.f32.mrf.mxu0 }
 0x27f   : > { %v6212_v52 = vpop.f32.mrf.mxu1 }
 0x281   : > { %v4505_v33 = vpop.f32.mrf.mxu1 }
 0x282   : > { %v6215_v51 = vadd.f32 %v4505_v33, %v6108_v56 }
 0x283   : > { %v2911_v22 = vpop.f32.mrf.mxu1 }
 0x284   : > { %6744 = vst [vmem:[#allocation6_spill] sm:$0xff] %v6215_v51  ;;  %v6220_v58 = vadd.f32 %v2911_v22, %v6111_v49  ;;  %v6238_v49 = vpop.f32.mrf.mxu0 }
 0x285   : > { %v6222_v8 = vpop.f32.mrf.mxu1 }
 0x286   : > { %6745 = vst [vmem:[#allocation7_spill] sm:$0xff] %v6220_v58  ;;  %6746 = vst [vmem:[#allocation8_spill] sm:$0xff] %v6222_v8 }
 0x287   : > { %v6226_v15 = vpop.f32.mrf.mxu1 }
 0x288   : > { %6747 = vst [vmem:[#allocation9_spill] sm:$0xff] %v6226_v15  ;;  %v6245_v15 = vpop.f32.mrf.mxu0 }
 0x289   : > { %v4509_v23 = vpop.f32.mrf.mxu1 }
 0x28a   : > { %v6229_v9 = vadd.f32 %v4509_v23, %v6124_v31 }
 0x28b   : > { %v2927_v56 = vpop.f32.mrf.mxu1 }
 0x28c   : > { %6748 = vst [vmem:[#allocation11_spill] sm:$0xff] %v6229_v9  ;;  %v6234_v33 = vadd.f32 %v2927_v56, %v6127_v54  ;;  %v6252_v54 = vpop.f32.mrf.mxu0 }
 0x28d   : > { %v6236_v51 = vpop.f32.mrf.mxu1 }
 0x28e   : > { %6749 = vst [vmem:[#allocation12_spill] sm:$0xff] %v6234_v33  ;;  %6750 = vst [vmem:[#allocation17_spill] sm:$0xff] %v6236_v51 }
 0x28f   : > { %v6240_v22 = vpop.f32.mrf.mxu1 }
 0x290   : > { %6751 = vst [vmem:[#allocation16_spill] sm:$0xff] %v6240_v22  ;;  %v6258_v22 = vpop.f32.mrf.mxu0 }
 0x291   : > { %v4513_v58 = vpop.f32.mrf.mxu1 }
 0x292   : > { %v6243_v8 = vadd.f32 %v4513_v58, %v6140_v2 }
 0x293   : > { %v2943_v23 = vpop.f32.mrf.mxu1 }
 0x294   : > { %v6248_v31 = vadd.f32 %v2943_v23, %v6143_v37  ;;  %v2776_v37 = vadd.f32 %v6047_v16, %v6035_v45  ;;  %v6266_v23 = vpop.f32.mrf.mxu0  ;;  %v6281_v45 = vld [vmem:[%s6568_s4] ss:$0 sm:$0xff] }
 0x295   : > { %v6250_v9 = vpop.f32.mrf.mxu1 }
 0x296   : > { %6752 = vst [vmem:[#allocation23_spill] sm:$0xff] %v6248_v31 }
 0x297   : > { %v6254_v56 = vpop.f32.mrf.mxu1 }
 0x298   : > { %6753 = vst [vmem:[#allocation25_spill] sm:$0xff] %v6254_v56  ;;  %v2774_v56 = vadd.f32 %v6054_v4, %v6039_v36 }
 0x299   : > { %v4517_v33 = vpop.f32.mrf.mxu1 }
 0x29a   : > { %v6256_v51 = vadd.f32 %v4517_v33, %v2803_v26  ;;  %v3174_v26 = vadd.f32 %v4523_v5, %v6157_v7  ;;  %v2977_v33 = vadd.f32 %v6164_v30, %v2776_v37  ;;  %v2780_v7 = vadd.f32 %v6064_v42, %v6052_v1 }
 0x29b   : > { %v2959_v25 = vpop.f32.mrf.mxu1  ;;  %v2778_v5 = vadd.f32 %v6071_v55, %v6056_v11 }
 0x29c   : > { %6754 = vst [vmem:[#allocation15_spill] sm:$0xff] %v6256_v51  ;;  %v6260_v2 = vadd.f32 %v2959_v25, %v2801_v53  ;;  %v3172_v25 = vadd.f32 %v3045_v18, %v6160_v20  ;;  %v2975_v53 = vadd.f32 %v6168_v47, %v2774_v56  ;;  %v3175_v36 = vadd.f32 %v6176_v28, %v2977_v33 }
 0x29d   : > { %v6262_v58 = vpop.f32.mrf.mxu1  ;;  %v2981_v18 = vadd.f32 %v6178_v35, %v2780_v7  ;;  %v3178_v28 = vadd.f32 %v6184_v39, %v6171_v0 }
 0x29e   : > { %6755 = vst [vmem:[#allocation21_spill] sm:$0xff] %v6260_v2  ;;  %6756 = vst [vmem:[#allocation27_spill] sm:$0xff] %v6262_v58  ;;  %v6276_v58 = vpop.f32.mrf.mxu0  ;;  %v3173_v20 = vadd.f32 %v6180_v50, %v2975_v53  ;;  %v3176_v50 = vadd.f32 %v6189_v61, %v6174_v38  ;;  %v2784_v38 = vadd.f32 %v6081_v13, %v6069_v29 }
 0x29f   : > { %v6268_v31 = vpop.f32.mrf.mxu1  ;;  %v3179_v53 = vadd.f32 %v6196_v14, %v2981_v18  ;;  %v2782_v14 = vadd.f32 %v6088_v10, %v6073_v59 }
 0x2a0   : > { %v6291_v56 = vpop.f32.mrf.mxu0 }
 0x2a1   : > { %v4557_v51 = vpop.f32.mrf.mxu1  ;;  %v2983_v59 = vadd.f32 %v6198_v6, %v2782_v14 }
 0x2a2   : > { %v3375_v2 = vadd.f32 %v4557_v51, %v3174_v26 }
 0x2a3   : > { %v3246_v16 = vpop.f32.mrf.mxu1 }
 0x2a4   : > { %v3373_v4 = vadd.f32 %v3246_v16, %v3172_v25  ;;  %v3414_v47 = vadd.f32 %v6281_v45, %v3375_v2  ;;  %v2979_v2 = vadd.f32 %v6182_v41, %v2778_v5  ;;  %v6302_v16 = vpop.f32.mrf.mxu0 }
 0x2a5   : > { %v4558_v30 = vpop.f32.mrf.mxu1 }
 0x2a6   : > { %v3376_v51 = vadd.f32 %v4558_v30, %v3175_v36  ;;  %v3412_v26 = vadd.f32 %v6281_v45, %v3373_v4  ;;  %v3446_v11 = vmax.f32 %v3414_v47, 0.0  ;;  %v3177_v41 = vadd.f32 %v6203_v40, %v2979_v2  ;;  %v6311_v5 = vpop.f32.mrf.mxu0 }
 0x2a7   : > { %v3249_v37 = vpop.f32.mrf.mxu1 }
 0x2a8   : > { %v3415_v1 = vadd.f32 %v6281_v45, %v3376_v51  ;;  %v3374_v42 = vadd.f32 %v3249_v37, %v3173_v20  ;;  %v3444_v39 = vmax.f32 %v3412_v26, 0.0  ;;  %v2985_v51 = vadd.f32 %v6194_v12, %v2784_v38 }
 0x2a9   : > { %v4561_v33 = vpop.f32.mrf.mxu1  ;;  %v3182_v37 = vadd.f32 %v6210_v17, %v6187_v60 }
 0x2aa   : > { %v3447_v55 = vmax.f32 %v3415_v1, 0.0  ;;  %v3413_v35 = vadd.f32 %v6281_v45, %v3374_v42  ;;  %v3379_v25 = vadd.f32 %v4561_v33, %v3178_v28  ;;  %v3180_v28 = vadd.f32 %v6217_v63, %v6192_v48  ;;  %v6324_v42 = vpop.f32.mrf.mxu0 }
 0x2ab   : > { %v3262_v0 = vpop.f32.mrf.mxu1  ;;  %v3183_v17 = vadd.f32 %v6224_v27, %v2985_v51  ;;  %v2788_v63 = vadd.f32 %v6098_v32, %v6086_v46  ;;  %v3181_v48 = vadd.f32 %v6231_v34, %v2983_v59  ;;  %v2786_v27 = vadd.f32 %v6103_v3, %v6090_v24 }
 0x2ac   : > { %v3477_v36 = vpack.c.bf16 %v3447_v55, %v3446_v11  ;;  %v3445_v4 = vmax.f32 %v3413_v35, 0.0  ;;  %v3377_v7 = vadd.f32 %v3262_v0, %v3176_v50  ;;  %v3418_v20 = vadd.f32 %v6281_v45, %v3379_v25 }
 0x2ad   : > { %v4562_v61 = vpop.f32.mrf.mxu1  ;;  %v2989_v0 = vadd.f32 %v6208_v19, %v2788_v63  ;;  %v2987_v24 = vadd.f32 %v6212_v52, %v2786_v27  ;;  %v6762_v27 = vld [vmem:[#allocation10_spill] sm:$0xff] }
 0x2ae   : > { %v3476_v30 = vpack.c.bf16 %v3445_v4, %v3444_v39  ;;  %v3380_v47 = vadd.f32 %v4562_v61, %v3179_v53  ;;  %v3416_v29 = vadd.f32 %v6281_v45, %v3377_v7  ;;  %v3450_v12 = vmax.f32 %v3418_v20, 0.0  ;;  %v6333_v39 = vpop.f32.mrf.mxu0 }
 0x2af   : > { %v3265_v18 = vpop.f32.mrf.mxu1  ;;  %v3186_v4 = vadd.f32 %v6238_v49, %v6201_v43  ;;  %v3184_v7 = vadd.f32 %v6245_v15, %v6206_v44  ;;  %v3187_v49 = vadd.f32 %v6252_v54, %v2989_v0  ;;  %v2792_v44 = vadd.f32 %v6114_v57, %v6101_v62 }
 0x2b0   : > { %v3419_v13 = vadd.f32 %v6281_v45, %v3380_v47  ;;  %v3378_v40 = vadd.f32 %v3265_v18, %v3177_v41  ;;  %4589 = vmatprep.mubr.msk.bf16.mxu0 %vm1530_vm4, %v3476_v30  ;;  %v3448_v2 = vmax.f32 %v3416_v29, 0.0  ;;  %v6346_v41 = vpop.f32.mrf.mxu0  ;;  %v3185_v15 = vadd.f32 %v6258_v22, %v2987_v24  ;;  %v6760_v22 = vld [vmem:[#allocation7_spill] sm:$0xff]  ;;  %v6765_v24 = vld [vmem:[#allocation22_spill] sm:$0xff] }
 0x2b1   : > { %v4565_v10 = vpop.f32.mrf.mxu1  ;;  %4590 = vmatmul.mubr.msk.bf16.vlgmr.msra.gmra.mxu0 %vm1530_vm4, %v3477_v36 }
 0x2b2   : > { %v3451_v26 = vmax.f32 %v3419_v13, 0.0  ;;  %v3417_v1 = vadd.f32 %v6281_v45, %v3378_v40  ;;  %v3383_v60 = vadd.f32 %v4565_v10, %v3182_v37  ;;  %v6757_v13 = vld [vmem:[#allocation14_spill] sm:$0xff]  ;;  %v6758_v40 = vld [vmem:[#allocation8_spill] sm:$0xff]  ;;  %v4547_v59 = vpop.f32.mrf.mxu0 }
 0x2b3   : > { %v3278_v50 = vpop.f32.mrf.mxu1  ;;  %v2790_v54 = vadd.f32 %v6757_v13, %v6106_v21 }
 0x2b4   : > { %v3479_v33 = vpack.c.bf16 %v3451_v26, %v3450_v12  ;;  %v3449_v11 = vmax.f32 %v3417_v1, 0.0  ;;  %v3381_v55 = vadd.f32 %v3278_v50, %v3180_v28  ;;  %v3422_v25 = vadd.f32 %v6281_v45, %v3383_v60  ;;  %v6759_v12 = vld [vmem:[#allocation6_spill] sm:$0xff]  ;;  %v3141_v63 = vpop.f32.mrf.mxu0 }
 0x2b5   : > { %v4566_v6 = vpop.f32.mrf.mxu1  ;;  %v2993_v28 = vadd.f32 %v6758_v40, %v2792_v44  ;;  %v3190_v26 = vadd.f32 %v6266_v23, %v6759_v12  ;;  %v3188_v60 = vadd.f32 %v6276_v58, %v6760_v22  ;;  %v6763_v58 = vld [vmem:[#allocation13_spill] sm:$0xff] }
 0x2b6   : > { %v3478_v35 = vpack.c.bf16 %v3449_v11, %v3448_v2  ;;  %v3384_v53 = vadd.f32 %v4566_v6, %v3183_v17  ;;  %v3420_v46 = vadd.f32 %v6281_v45, %v3381_v55  ;;  %v3454_v19 = vmax.f32 %v3422_v25, 0.0  ;;  %v6761_v17 = vld [vmem:[#allocation9_spill] sm:$0xff] }
 0x2b7   : > { %v3281_v36 = vpop.f32.mrf.mxu1  ;;  %v2991_v50 = vadd.f32 %v6761_v17, %v2790_v54  ;;  %v3191_v55 = vadd.f32 %v6291_v56, %v2993_v28  ;;  %v2796_v0 = vadd.f32 %v6763_v58, %v6762_v27  ;;  %v6766_v56 = vld [vmem:[#allocation17_spill] sm:$0xff] }
 0x2b8   : > { %v3423_v32 = vadd.f32 %v6281_v45, %v3384_v53  ;;  %v3382_v34 = vadd.f32 %v3281_v36, %v3181_v48  ;;  %4593 = vmatprep.mubr.msk.bf16.mxu0 %vm1530_vm4, %v3478_v35  ;;  %v3452_v20 = vmax.f32 %v3420_v46, 0.0 }
 0x2b9   : > { %v4569_v3 = vpop.f32.mrf.mxu1  ;;  %4594 = vmatmul.mubr.msk.bf16.gmra.mxu0 %vm1530_vm4, %v3479_v33 }
 0x2ba   : > { %v3455_v38 = vmax.f32 %v3423_v32, 0.0  ;;  %v3421_v61 = vadd.f32 %v6281_v45, %v3382_v34  ;;  %v3387_v43 = vadd.f32 %v4569_v3, %v3186_v4  ;;  %v3189_v4 = vadd.f32 %v6302_v16, %v2991_v50  ;;  %v6768_v16 = vld [vmem:[#allocation12_spill] sm:$0xff]  ;;  %v6772_v50 = vld [vmem:[#allocation19_spill] sm:$0xff] }
 0x2bb   : > { %v3294_v30 = vpop.f32.mrf.mxu1 }
 0x2bc   : > { %v3481_v47 = vpack.c.bf16 %v3455_v38, %v3454_v19  ;;  %v3453_v14 = vmax.f32 %v3421_v61, 0.0  ;;  %v3385_v51 = vadd.f32 %v3294_v30, %v3184_v7  ;;  %v3426_v37 = vadd.f32 %v6281_v45, %v3387_v43  ;;  %v6764_v7 = vld [vmem:[#allocation20_spill] sm:$0xff]  ;;  %v4548_v38 = vpop.f32.mrf.mxu0  ;;  %v6767_v43 = vld [vmem:[#allocation11_spill] sm:$0xff] }
 0x2bd   : > { %v4570_v52 = vpop.f32.mrf.mxu1  ;;  %v2794_v3 = vadd.f32 %v6765_v24, %v6764_v7  ;;  %v2997_v19 = vadd.f32 %v6766_v56, %v2796_v0  ;;  %v6776_v24 = vld [vmem:[#allocation26_spill] sm:$0xff] }
 0x2be   : > { %v3480_v18 = vpack.c.bf16 %v3453_v14, %v3452_v20  ;;  %v3388_v29 = vadd.f32 %v4570_v52, %v3187_v49  ;;  %v3424_v1 = vadd.f32 %v6281_v45, %v3385_v51  ;;  %v3458_v2 = vmax.f32 %v3426_v37, 0.0  ;;  %v6769_v51 = vld [vmem:[#allocation16_spill] sm:$0xff]  ;;  %v3144_v13 = vpop.f32.mrf.mxu0 }
 0x2bf   : > { %v3297_v10 = vpop.f32.mrf.mxu1  ;;  %v3194_v49 = vadd.f32 %v6311_v5, %v6767_v43  ;;  %v3192_v14 = vadd.f32 %v6324_v42, %v6768_v16  ;;  %v2995_v44 = vadd.f32 %v6769_v51, %v2794_v3  ;;  %v6771_v42 = vld [vmem:[#allocation24_spill] sm:$0xff]  ;;  %v6780_v16 = vld [vmem:[#allocation27_spill] sm:$0xff] }
 0x2c0   : > { %v3427_v62 = vadd.f32 %v6281_v45, %v3388_v29  ;;  %v3386_v57 = vadd.f32 %v3297_v10, %v3185_v15  ;;  %4597 = vmatprep.mubr.msk.bf16.mxu0 %vm1530_vm4, %v3480_v18  ;;  %v3456_v48 = vmax.f32 %v3424_v1, 0.0  ;;  %v3195_v29 = vadd.f32 %v6333_v39, %v2997_v19  ;;  %v6777_v3 = vld [vmem:[#allocation4_spill] sm:$0xff] }
 0x2c1   : > { %v4573_v21 = vpop.f32.mrf.mxu1  ;;  %4598 = vmatmul.mubr.msk.bf16.gmra.mxu0 %vm1530_vm4, %v3481_v47 }
 0x2c2   : > { %v3459_v33 = vmax.f32 %v3427_v62, 0.0  ;;  %v3425_v11 = vadd.f32 %v6281_v45, %v3386_v57  ;;  %v3391_v23 = vadd.f32 %v4573_v21, %v3190_v26  ;;  %v6770_v26 = vld [vmem:[#allocation18_spill] sm:$0xff]  ;;  %v3193_v57 = vadd.f32 %v6346_v41, %v2995_v44  ;;  %v6774_v41 = vld [vmem:[#allocation23_spill] sm:$0xff] }
 0x2c3   : > { %v3310_v6 = vpop.f32.mrf.mxu1  ;;  %v2800_v1 = vadd.f32 %v6771_v42, %v6770_v26  ;;  %v6773_v21 = vld [vmem:[#allocation2_spill] sm:$0xff]  ;;  %v6781_v44 = vld [vmem:[#allocation15_spill] sm:$0xff] }
 0x2c4   : > { %v3483_v35 = vpack.c.bf16 %v3459_v33, %v3458_v2  ;;  %v3457_v25 = vmax.f32 %v3425_v11, 0.0  ;;  %v3389_v53 = vadd.f32 %v3310_v6, %v3188_v60  ;;  %v3430_v32 = vadd.f32 %v6281_v45, %v3391_v23  ;;  %v4551_v33 = vpop.f32.mrf.mxu0 }
 0x2c5   : > { %v4574_v36 = vpop.f32.mrf.mxu1  ;;  %v2798_v2 = vadd.f32 %v6773_v21, %v6772_v50  ;;  %v3001_v39 = vadd.f32 %v6250_v9, %v2800_v1  ;;  %v3198_v23 = vadd.f32 %v4547_v59, %v6243_v8 }
 0x2c6   : > { %v3482_v46 = vpack.c.bf16 %v3457_v25, %v3456_v48  ;;  %v3392_v34 = vadd.f32 %v4574_v36, %v3191_v55  ;;  %v3428_v30 = vadd.f32 %v6281_v45, %v3389_v53  ;;  %v3462_v15 = vmax.f32 %v3430_v32, 0.0  ;;  %v6775_v25 = vld [vmem:[#allocation25_spill] sm:$0xff]  ;;  %v3157_v59 = vpop.f32.mrf.mxu0 }
 0x2c7   : > { %v3313_v61 = vpop.f32.mrf.mxu1  ;;  %v2999_v53 = vadd.f32 %v6775_v25, %v2798_v2  ;;  %v3199_v8 = vadd.f32 %v4548_v38, %v3001_v39 }
 0x2c8   : > { %v3431_v20 = vadd.f32 %v6281_v45, %v3392_v34  ;;  %v3390_v47 = vadd.f32 %v3313_v61, %v3189_v4  ;;  %4601 = vmatprep.mubr.msk.bf16.mxu0 %vm1530_vm4, %v3482_v46  ;;  %v3460_v40 = vmax.f32 %v3428_v30, 0.0  ;;  %v6778_v30 = vld [vmem:[#allocation3_spill] sm:$0xff] }
 0x2c9   : > { %v4577_v52 = vpop.f32.mrf.mxu1  ;;  %4602 = vmatmul.mubr.msk.bf16.gmra.mxu0 %vm1530_vm4, %v3483_v35  ;;  %v3196_v35 = vadd.f32 %v3141_v63, %v6774_v41  ;;  %v2804_v63 = vadd.f32 %v6777_v3, %v6776_v24  ;;  %v3197_v19 = vadd.f32 %v3144_v13, %v2999_v53  ;;  %v4646_v3 = vld [vmem:[%s4749_s10 + $0x18] sm:$0xff] }
 0x2ca   : > { %v3463_v18 = vmax.f32 %v3431_v20, 0.0  ;;  %v3429_v37 = vadd.f32 %v6281_v45, %v3390_v47  ;;  %v3395_v5 = vadd.f32 %v4577_v52, %v3194_v49  ;;  %v6779_v20 = vld [vmem:[#allocation5_spill] sm:$0xff]  ;;  %v3202_v52 = vadd.f32 %v4551_v33, %v6781_v44 }
 0x2cb   : > { %v3326_v54 = vpop.f32.mrf.mxu1  ;;  %v2802_v47 = vadd.f32 %v6779_v20, %v6778_v30  ;;  %v3005_v38 = vadd.f32 %v6780_v16, %v2804_v63  ;;  %v4648_v16 = vld [vmem:[%s4749_s10 + $0x30] sm:$0xff] }
 0x2cc   : > { %v3485_v28 = vpack.c.bf16 %v3463_v18, %v3462_v15  ;;  %v3461_v10 = vmax.f32 %v3429_v37, 0.0  ;;  %v3393_v12 = vadd.f32 %v3326_v54, %v3192_v14  ;;  %v3434_v60 = vadd.f32 %v6281_v45, %v3395_v5  ;;  %v4552_v14 = vpop.f32.mrf.mxu0  ;;  %v6782_v5 = vld [vmem:[#allocation21_spill] sm:$0xff] }
 0x2cd   : > { %v4578_v62 = vpop.f32.mrf.mxu1  ;;  %v3003_v13 = vadd.f32 %v6268_v31, %v2802_v47  ;;  %v3203_v26 = vadd.f32 %v4552_v14, %v3005_v38 }
 0x2ce   : > { %v3484_v22 = vpack.c.bf16 %v3461_v10, %v3460_v40  ;;  %v3396_v17 = vadd.f32 %v4578_v62, %v3195_v29  ;;  %v3432_v55 = vadd.f32 %v6281_v45, %v3393_v12  ;;  %v3466_v58 = vmax.f32 %v3434_v60, 0.0  ;;  %v3160_v42 = vpop.f32.mrf.mxu0 }
 0x2cf   : > { %v3329_v11 = vpop.f32.mrf.mxu1  ;;  %v3200_v29 = vadd.f32 %v3157_v59, %v6782_v5  ;;  %v3201_v50 = vadd.f32 %v3160_v42, %v3003_v13 }
 0x2d0   : > { %v3435_v6 = vadd.f32 %v6281_v45, %v3396_v17  ;;  %v3394_v48 = vadd.f32 %v3329_v11, %v3193_v57  ;;  %4605 = vmatprep.mubr.msk.bf16.mxu0 %vm1530_vm4, %v3484_v22  ;;  %v3464_v46 = vmax.f32 %v3432_v55, 0.0 }
 0x2d1   : > { %v4581_v27 = vpop.f32.mrf.mxu1  ;;  %4606 = vmatmul.mubr.msk.bf16.gmra.mxu0 %vm1530_vm4, %v3485_v28 }
 0x2d2   : > { %v3467_v9 = vmax.f32 %v3435_v6, 0.0  ;;  %v3433_v0 = vadd.f32 %v6281_v45, %v3394_v48  ;;  %v3399_v36 = vadd.f32 %v4581_v27, %v3198_v23  ;;  %v6424_v27 = vld [vmem:[%s6570_s6] ss:$0 sm:$0xff] }
 0x2d3   : > { %v3342_v4 = vpop.f32.mrf.mxu1 }
 0x2d4   : > { %v3487_v32 = vpack.c.bf16 %v3467_v9, %v3466_v58  ;;  %v3465_v34 = vmax.f32 %v3433_v0, 0.0  ;;  %v3397_v7 = vadd.f32 %v3342_v4, %v3196_v35  ;;  %v3438_v43 = vadd.f32 %v6281_v45, %v3399_v36 }
 0x2d5   : > { %v4582_v56 = vpop.f32.mrf.mxu1 }
 0x2d6   : > { %v3486_v61 = vpack.c.bf16 %v3465_v34, %v3464_v46  ;;  %v3400_v49 = vadd.f32 %v4582_v56, %v3199_v8  ;;  %v3436_v15 = vadd.f32 %v6281_v45, %v3397_v7  ;;  %v3470_v40 = vmax.f32 %v3438_v43, 0.0  ;;  %v4645_v46 = vld [vmem:[%s4749_s10] sm:$0xff]  ;;  %v4647_v43 = vld [vmem:[%s4749_s10 + $0x8] sm:$0xff] }
 0x2d7   : > { %v3345_v51 = vpop.f32.mrf.mxu1 }
 0x2d8   : > { %v3439_v18 = vadd.f32 %v6281_v45, %v3400_v49  ;;  %v3398_v37 = vadd.f32 %v3345_v51, %v3197_v19  ;;  %4609 = vmatprep.mubr.msk.bf16.mxu0 %vm1530_vm4, %v3486_v61  ;;  %v3468_v62 = vmax.f32 %v3436_v15, 0.0 }
 0x2d9   : > { %v4585_v54 = vpop.f32.mrf.mxu1  ;;  %4610 = vmatmul.mubr.msk.bf16.gmra.mxu0 %vm1530_vm4, %v3487_v32 }
 0x2da   : > { %v3471_v28 = vmax.f32 %v3439_v18, 0.0  ;;  %v3437_v10 = vadd.f32 %v6281_v45, %v3398_v37  ;;  %v3403_v12 = vadd.f32 %v4585_v54, %v3202_v52  ;;  %v4649_v52 = vld [vmem:[%s4749_s10 + $0x20] sm:$0xff] }
 0x2db   : > { %v3358_v1 = vpop.f32.mrf.mxu1 }
 0x2dc   : > { %v3489_v57 = vpack.c.bf16 %v3471_v28, %v3470_v40  ;;  %v3469_v22 = vmax.f32 %v3437_v10, 0.0  ;;  %v3401_v60 = vadd.f32 %v3358_v1, %v3200_v29  ;;  %v3442_v31 = vadd.f32 %v6281_v45, %v3403_v12  ;;  %v4650_v29 = vld [vmem:[%s4749_s10 + $0x38] sm:$0xff]  ;;  %v4651_v10 = vld [vmem:[%s4749_s10 + $0x28] sm:$0xff] }
 0x2dd   : > { %v4586_v17 = vpop.f32.mrf.mxu1 }
 0x2de   : > { %v3488_v21 = vpack.c.bf16 %v3469_v22, %v3468_v62  ;;  %v3404_v2 = vadd.f32 %v4586_v17, %v3203_v26  ;;  %v3440_v33 = vadd.f32 %v6281_v45, %v3401_v60  ;;  %v3474_v55 = vmax.f32 %v3442_v31, 0.0  ;;  %v4652_v62 = vld [vmem:[%s4749_s10 + $0x50] sm:$0xff] }
 0x2df   : > { %v3361_v39 = vpop.f32.mrf.mxu1 }
 0x2e0   : > { %v3443_v11 = vadd.f32 %v6281_v45, %v3404_v2  ;;  %v3402_v23 = vadd.f32 %v3361_v39, %v3201_v50  ;;  %4613 = vmatprep.mubr.msk.bf16.mxu0 %vm1530_vm4, %v3488_v21  ;;  %v3472_v41 = vmax.f32 %v3440_v33, 0.0  ;;  %v4653_v50 = vld [vmem:[%s4749_s10 + $0x40] sm:$0xff]  ;;  %v4654_v33 = vld [vmem:[%s4749_s10 + $0x58] sm:$0xff] }
 0x2e1   : > { %4614 = vmatmul.mubr.msk.bf16.gmra.mxu0 %vm1530_vm4, %v3489_v57 }
 0x2e2   : > { %v3475_v6 = vmax.f32 %v3443_v11, 0.0  ;;  %v3441_v48 = vadd.f32 %v6281_v45, %v3402_v23  ;;  %v4644_v45 = vld [vmem:[%s4749_s10 + $0x10] sm:$0xff] }
 0x2e4   : > { %v3491_v35 = vpack.c.bf16 %v3475_v6, %v3474_v55  ;;  %v3473_v25 = vmax.f32 %v3441_v48, 0.0  ;;  %v4655_v48 = vld [vmem:[%s4749_s10 + $0x48] sm:$0xff] }
 0x2e6   : > { %v3490_v53 = vpack.c.bf16 %v3473_v25, %v3472_v41 }
 0x2e8   : > { %4617 = vmatprep.mubr.msk.bf16.mxu0 %vm1530_vm4, %v3490_v53 }
 0x2e9   : > { %4618 = vmatmul.mubr.msk.bf16.gmra.mxu0 %vm1530_vm4, %v3491_v35 }
 0x371   : > { %v4591_v58 = vpop.f32.mrf.mxu0 }
 0x372   : > { %v3594_v9 = vadd.f32 %v4591_v58, %v6424_v27  ;;  %v4656_v58 = vld [vmem:[%s4749_s10 + $0x70] sm:$0xff] }
 0x373   : > { %v3585_v0 = vpop.f32.mrf.mxu0 }
 0x374   : > { %v3714_v36 = vadd.f32 %v4644_v45, %v3594_v9  ;;  %v3586_v8 = vadd.f32 %v6424_v27, %v3585_v0 }
 0x375   : > { %v4592_v59 = vpop.f32.mrf.mxu0 }
 0x376   : > { %v3746_v4 = vmax.f32 %v3714_v36, 0.0  ;;  %v3712_v32 = vadd.f32 %v4645_v46, %v3586_v8  ;;  %v3597_v34 = vadd.f32 %v4592_v59, %v6424_v27  ;;  %v4657_v8 = vld [vmem:[%s4749_s10 + $0x60] sm:$0xff] }
 0x377   : > { %v3588_v7 = vpop.f32.mrf.mxu0 }
 0x378   : > { %3778 = vst.msk [vmem:[%s6434_s18 + $0x10] sm:$0xff] %vm343_vm1, %v3746_v4  ;;  %v3744_v24 = vmax.f32 %v3712_v32, 0.0  ;;  %v3715_v63 = vadd.f32 %v4646_v3, %v3597_v34  ;;  %v3589_v56 = vadd.f32 %v6424_v27, %v3588_v7  ;;  %v4658_v34 = vld [vmem:[%s4749_s10 + $0x78] sm:$0xff] }
 0x379   : > { %v4595_v19 = vpop.f32.mrf.mxu0 }
 0x37a   : > { %3776 = vst.msk [vmem:[%s6434_s18] sm:$0xff] %vm343_vm1, %v3744_v24  ;;  %v3747_v61 = vmax.f32 %v3715_v63, 0.0  ;;  %v3713_v49 = vadd.f32 %v4647_v43, %v3589_v56  ;;  %v3610_v30 = vadd.f32 %v4595_v19, %v6424_v27  ;;  %v4659_v56 = vld [vmem:[%s4749_s10 + $0x68] sm:$0xff] }
 0x37b   : > { %v3601_v20 = vpop.f32.mrf.mxu0 }
 0x37c   : > { %3779 = vst.msk [vmem:[%s6434_s18 + $0x18] sm:$0xff] %vm343_vm1, %v3747_v61  ;;  %v3745_v47 = vmax.f32 %v3713_v49, 0.0  ;;  %v3718_v38 = vadd.f32 %v4648_v16, %v3610_v30  ;;  %v3602_v14 = vadd.f32 %v6424_v27, %v3601_v20  ;;  %v4660_v30 = vld [vmem:[%s4749_s10 + $0x90] sm:$0xff] }
 0x37d   : > { %v4596_v51 = vpop.f32.mrf.mxu0 }
 0x37e   : > { %3777 = vst.msk [vmem:[%s6434_s18 + $0x8] sm:$0xff] %vm343_vm1, %v3745_v47  ;;  %v3750_v44 = vmax.f32 %v3718_v38, 0.0  ;;  %v3716_v15 = vadd.f32 %v4649_v52, %v3602_v14  ;;  %v3613_v18 = vadd.f32 %v4596_v51, %v6424_v27  ;;  %v4661_v14 = vld [vmem:[%s4749_s10 + $0x80] sm:$0xff] }
 0x37f   : > { %v3604_v37 = vpop.f32.mrf.mxu0 }
 0x380   : > { %3782 = vst.msk [vmem:[%s6434_s18 + $0x30] sm:$0xff] %vm343_vm1, %v3750_v44  ;;  %v3748_v5 = vmax.f32 %v3716_v15, 0.0  ;;  %v3719_v13 = vadd.f32 %v4650_v29, %v3613_v18  ;;  %v3605_v54 = vadd.f32 %v6424_v27, %v3604_v37  ;;  %v4662_v18 = vld [vmem:[%s4749_s10 + $0x98] sm:$0xff] }
 0x381   : > { %v4599_v40 = vpop.f32.mrf.mxu0 }
 0x382   : > { %3780 = vst.msk [vmem:[%s6434_s18 + $0x20] sm:$0xff] %vm343_vm1, %v3748_v5  ;;  %v3751_v28 = vmax.f32 %v3719_v13, 0.0  ;;  %v3717_v12 = vadd.f32 %v4651_v10, %v3605_v54  ;;  %v3626_v26 = vadd.f32 %v4599_v40, %v6424_v27  ;;  %v4663_v54 = vld [vmem:[%s4749_s10 + $0x88] sm:$0xff] }
 0x383   : > { %v3617_v42 = vpop.f32.mrf.mxu0 }
 0x384   : > { %3783 = vst.msk [vmem:[%s6434_s18 + $0x38] sm:$0xff] %vm343_vm1, %v3751_v28  ;;  %v3749_v1 = vmax.f32 %v3717_v12, 0.0  ;;  %v3722_v57 = vadd.f32 %v4652_v62, %v3626_v26  ;;  %v3618_v22 = vadd.f32 %v6424_v27, %v3617_v42  ;;  %v4664_v26 = vld [vmem:[%s4749_s10 + $0xb0] sm:$0xff] }
 0x385   : > { %v4600_v60 = vpop.f32.mrf.mxu0 }
 0x386   : > { %3781 = vst.msk [vmem:[%s6434_s18 + $0x28] sm:$0xff] %vm343_vm1, %v3749_v1  ;;  %v3754_v17 = vmax.f32 %v3722_v57, 0.0  ;;  %v3720_v21 = vadd.f32 %v4653_v50, %v3618_v22  ;;  %v3629_v31 = vadd.f32 %v4600_v60, %v6424_v27  ;;  %v4665_v22 = vld [vmem:[%s4749_s10 + $0xa0] sm:$0xff] }
 0x387   : > { %v3620_v2 = vpop.f32.mrf.mxu0 }
 0x388   : > { %3786 = vst.msk [vmem:[%s6434_s18 + $0x50] sm:$0xff] %vm343_vm1, %v3754_v17  ;;  %v3752_v39 = vmax.f32 %v3720_v21, 0.0  ;;  %v3723_v11 = vadd.f32 %v4654_v33, %v3629_v31  ;;  %v3621_v23 = vadd.f32 %v6424_v27, %v3620_v2  ;;  %v4666_v31 = vld [vmem:[%s4749_s10 + $0xb8] sm:$0xff] }
 0x389   : > { %v4603_v55 = vpop.f32.mrf.mxu0 }
 0x38a   : > { %3784 = vst.msk [vmem:[%s6434_s18 + $0x40] sm:$0xff] %vm343_vm1, %v3752_v39  ;;  %v3755_v6 = vmax.f32 %v3723_v11, 0.0  ;;  %v3721_v41 = vadd.f32 %v4655_v48, %v3621_v23  ;;  %v3642_v35 = vadd.f32 %v4603_v55, %v6424_v27  ;;  %v4667_v23 = vld [vmem:[%s4749_s10 + $0xa8] sm:$0xff] }
 0x38b   : > { %v3633_v25 = vpop.f32.mrf.mxu0 }
 0x38c   : > { %3787 = vst.msk [vmem:[%s6434_s18 + $0x58] sm:$0xff] %vm343_vm1, %v3755_v6  ;;  %v3753_v53 = vmax.f32 %v3721_v41, 0.0  ;;  %v3726_v9 = vadd.f32 %v4656_v58, %v3642_v35  ;;  %v3634_v0 = vadd.f32 %v6424_v27, %v3633_v25  ;;  %v4668_v35 = vld [vmem:[%s4749_s10 + $0xd0] sm:$0xff] }
 0x38d   : > { %v4604_v45 = vpop.f32.mrf.mxu0 }
 0x38e   : > { %3785 = vst.msk [vmem:[%s6434_s18 + $0x48] sm:$0xff] %vm343_vm1, %v3753_v53  ;;  %v3758_v36 = vmax.f32 %v3726_v9, 0.0  ;;  %v3724_v59 = vadd.f32 %v4657_v8, %v3634_v0  ;;  %v3645_v4 = vadd.f32 %v4604_v45, %v6424_v27  ;;  %v4669_v0 = vld [vmem:[%s4749_s10 + $0xc0] sm:$0xff] }
 0x38f   : > { %v3636_v46 = vpop.f32.mrf.mxu0 }
 0x390   : > { %3790 = vst.msk [vmem:[%s6434_s18 + $0x70] sm:$0xff] %vm343_vm1, %v3758_v36  ;;  %v3756_v32 = vmax.f32 %v3724_v59, 0.0  ;;  %v3727_v7 = vadd.f32 %v4658_v34, %v3645_v4  ;;  %v3637_v24 = vadd.f32 %v6424_v27, %v3636_v46  ;;  %v4670_v4 = vld [vmem:[%s4749_s10 + $0xd8] sm:$0xff] }
 0x391   : > { %v4607_v3 = vpop.f32.mrf.mxu0 }
 0x392   : > { %3788 = vst.msk [vmem:[%s6434_s18 + $0x60] sm:$0xff] %vm343_vm1, %v3756_v32  ;;  %v3759_v63 = vmax.f32 %v3727_v7, 0.0  ;;  %v3725_v19 = vadd.f32 %v4659_v56, %v3637_v24  ;;  %v3658_v61 = vadd.f32 %v4607_v3, %v6424_v27  ;;  %v4671_v24 = vld [vmem:[%s4749_s10 + $0xc8] sm:$0xff] }
 0x393   : > { %v3649_v43 = vpop.f32.mrf.mxu0 }
 0x394   : > { %3791 = vst.msk [vmem:[%s6434_s18 + $0x78] sm:$0xff] %vm343_vm1, %v3759_v63  ;;  %v3757_v49 = vmax.f32 %v3725_v19, 0.0  ;;  %v3730_v20 = vadd.f32 %v4660_v30, %v3658_v61  ;;  %v3650_v47 = vadd.f32 %v6424_v27, %v3649_v43  ;;  %v4672_v61 = vld [vmem:[%s4749_s10 + $0xf0] sm:$0xff] }
 0x395   : > { %v4608_v16 = vpop.f32.mrf.mxu0 }
 0x396   : > { %3789 = vst.msk [vmem:[%s6434_s18 + $0x68] sm:$0xff] %vm343_vm1, %v3757_v49  ;;  %v3762_v38 = vmax.f32 %v3730_v20, 0.0  ;;  %v3728_v51 = vadd.f32 %v4661_v14, %v3650_v47  ;;  %v3661_v44 = vadd.f32 %v4608_v16, %v6424_v27  ;;  %v4673_v47 = vld [vmem:[%s4749_s10 + $0xe0] sm:$0xff] }
 0x397   : > { %v3652_v52 = vpop.f32.mrf.mxu0 }
 0x398   : > { %3794 = vst.msk [vmem:[%s6434_s18 + $0x90] sm:$0xff] %vm343_vm1, %v3762_v38  ;;  %v3760_v15 = vmax.f32 %v3728_v51, 0.0  ;;  %v3731_v37 = vadd.f32 %v4662_v18, %v3661_v44  ;;  %v3653_v5 = vadd.f32 %v6424_v27, %v3652_v52  ;;  %v4674_v44 = vld [vmem:[%s4749_s10 + $0xf8] sm:$0xff] }
 0x399   : > { %v4611_v29 = vpop.f32.mrf.mxu0 }
 0x39a   : > { %3792 = vst.msk [vmem:[%s6434_s18 + $0x80] sm:$0xff] %vm343_vm1, %v3760_v15  ;;  %v3763_v13 = vmax.f32 %v3731_v37, 0.0  ;;  %v3729_v40 = vadd.f32 %v4663_v54, %v3653_v5  ;;  %v3674_v28 = vadd.f32 %v4611_v29, %v6424_v27  ;;  %v4675_v37 = vld [vmem:[%s4749_s10 + $0xe8] sm:$0xff] }
 0x39b   : > { %v3665_v10 = vpop.f32.mrf.mxu0 }
 0x39c   : > { %3795 = vst.msk [vmem:[%s6434_s18 + $0x98] sm:$0xff] %vm343_vm1, %v3763_v13  ;;  %v3761_v12 = vmax.f32 %v3729_v40, 0.0  ;;  %v3734_v42 = vadd.f32 %v4664_v26, %v3674_v28  ;;  %v3666_v1 = vadd.f32 %v6424_v27, %v3665_v10 }
 0x39d   : > { %v4612_v62 = vpop.f32.mrf.mxu0 }
 0x39e   : > { %3793 = vst.msk [vmem:[%s6434_s18 + $0x88] sm:$0xff] %vm343_vm1, %v3761_v12  ;;  %v3766_v57 = vmax.f32 %v3734_v42, 0.0  ;;  %v3732_v60 = vadd.f32 %v4665_v22, %v3666_v1  ;;  %v3677_v17 = vadd.f32 %v4612_v62, %v6424_v27 }
 0x39f   : > { %v3668_v50 = vpop.f32.mrf.mxu0 }
 0x3a0   : > { %3798 = vst.msk [vmem:[%s6434_s18 + $0xb0] sm:$0xff] %vm343_vm1, %v3766_v57  ;;  %v3764_v21 = vmax.f32 %v3732_v60, 0.0  ;;  %v3735_v2 = vadd.f32 %v4666_v31, %v3677_v17  ;;  %v3669_v39 = vadd.f32 %v6424_v27, %v3668_v50 }
 0x3a1   : > { %v4615_v33 = vpop.f32.mrf.mxu0 }
 0x3a2   : > { %3796 = vst.msk [vmem:[%s6434_s18 + $0xa0] sm:$0xff] %vm343_vm1, %v3764_v21  ;;  %v3767_v11 = vmax.f32 %v3735_v2, 0.0  ;;  %v3733_v55 = vadd.f32 %v4667_v23, %v3669_v39  ;;  %v3690_v6 = vadd.f32 %v4615_v33, %v6424_v27 }
 0x3a3   : > { %v3681_v48 = vpop.f32.mrf.mxu0 }
 0x3a4   : > { %3799 = vst.msk [vmem:[%s6434_s18 + $0xb8] sm:$0xff] %vm343_vm1, %v3767_v11  ;;  %v3765_v41 = vmax.f32 %v3733_v55, 0.0  ;;  %v3738_v25 = vadd.f32 %v4668_v35, %v3690_v6  ;;  %v3682_v53 = vadd.f32 %v6424_v27, %v3681_v48 }
 0x3a5   : > { %v4616_v58 = vpop.f32.mrf.mxu0 }
 0x3a6   : > { %3797 = vst.msk [vmem:[%s6434_s18 + $0xa8] sm:$0xff] %vm343_vm1, %v3765_v41  ;;  %v3770_v9 = vmax.f32 %v3738_v25, 0.0  ;;  %v3736_v45 = vadd.f32 %v4669_v0, %v3682_v53  ;;  %v3693_v36 = vadd.f32 %v4616_v58, %v6424_v27 }
 0x3a7   : > { %v3684_v8 = vpop.f32.mrf.mxu0 }
 0x3a8   : > { %3802 = vst.msk [vmem:[%s6434_s18 + $0xd0] sm:$0xff] %vm343_vm1, %v3770_v9  ;;  %v3768_v59 = vmax.f32 %v3736_v45, 0.0  ;;  %v3739_v46 = vadd.f32 %v4670_v4, %v3693_v36  ;;  %v3685_v32 = vadd.f32 %v6424_v27, %v3684_v8 }
 0x3a9   : > { %v4619_v34 = vpop.f32.mrf.mxu0 }
 0x3aa   : > { %3800 = vst.msk [vmem:[%s6434_s18 + $0xc0] sm:$0xff] %vm343_vm1, %v3768_v59  ;;  %v3771_v7 = vmax.f32 %v3739_v46, 0.0  ;;  %v3737_v3 = vadd.f32 %v4671_v24, %v3685_v32  ;;  %v3706_v63 = vadd.f32 %v4619_v34, %v6424_v27 }
 0x3ab   : > { %v3697_v56 = vpop.f32.mrf.mxu0 }
 0x3ac   : > { %3803 = vst.msk [vmem:[%s6434_s18 + $0xd8] sm:$0xff] %vm343_vm1, %v3771_v7  ;;  %v3769_v19 = vmax.f32 %v3737_v3, 0.0  ;;  %v3742_v43 = vadd.f32 %v4672_v61, %v3706_v63  ;;  %v3698_v49 = vadd.f32 %v6424_v27, %v3697_v56 }
 0x3ad   : > { %v4620_v30 = vpop.f32.mrf.mxu0 }
 0x3ae   : > { %3801 = vst.msk [vmem:[%s6434_s18 + $0xc8] sm:$0xff] %vm343_vm1, %v3769_v19  ;;  %v3774_v20 = vmax.f32 %v3742_v43, 0.0  ;;  %v3740_v16 = vadd.f32 %v4673_v47, %v3698_v49  ;;  %v3709_v38 = vadd.f32 %v4620_v30, %v6424_v27 }
 0x3af   : > { %v3700_v14 = vpop.f32.mrf.mxu0 }
 0x3b0   : > { %3806 = vst.msk [vmem:[%s6434_s18 + $0xf0] sm:$0xff] %vm343_vm1, %v3774_v20  ;;  %v3772_v51 = vmax.f32 %v3740_v16, 0.0  ;;  %v3743_v52 = vadd.f32 %v4674_v44, %v3709_v38  ;;  %v3701_v15 = vadd.f32 %v6424_v27, %v3700_v14 }
 0x3b2   : > { %3804 = vst.msk [vmem:[%s6434_s18 + $0xe0] sm:$0xff] %vm343_vm1, %v3772_v51  ;;  %v3775_v18 = vmax.f32 %v3743_v52, 0.0  ;;  %v3741_v5 = vadd.f32 %v4675_v37, %v3701_v15 }
 0x3b4   : > { %3807 = vst.msk [vmem:[%s6434_s18 + $0xf8] sm:$0xff] %vm343_vm1, %v3775_v18  ;;  %v3773_v29 = vmax.f32 %v3741_v5, 0.0 }
 0x3b6   : > { %3805 = vst.msk [vmem:[%s6434_s18 + $0xe8] sm:$0xff] %vm343_vm1, %v3773_v29 }
 0x3b7 PF: > { %s17_s24 = sadd.s32 1, %s4682_s24  }
 0x3b8   : > { %p14_p4 = scmp.ge.s32.totalorder %s17_s24, 4  }
 0x3ba   :  { %16 = sbr.rel (!%p14_p4) target bundleno = 1 (0x1), region = 86 }

</bundles_post_ra>
